<compile_context>
chip_gen: v5e
topology: v5e:2x2
jax: 0.10.0
libtpu: 0.0.40
codegen_flags: <defaults>
</compile_context>

<pallas_src>
import functools

import jax
import jax.numpy as jnp
from jax.experimental import pallas as pl
from jax.experimental.pallas import tpu as pltpu


# ------------------------------ fused kernel ------------------------------- #

def _net_fused_kernel(feat0_ref, c_ref, adj_ref, adjt_ref,
                      w0s_ref, fcw0_ref, fcb0_ref,
                      w1s_ref, fcw1_ref, fcb1_ref,
                      psflat_ref, combt_ref, uidx_ref, midx_ref,
                      node_out_ref, pred_ref, loss_ref,
                      ue_ref, me_ref,
                      *, nu: int, slope: float = 0.1):
    """Fused IMC-GAE forward: 2 GCMC layers + BiDecoder + basis cosine reg."""
    r_count = adj_ref.shape[0]
    c_all = c_ref[...]                               # (N, 1) stacked [cu; cm]

    def gcmc_layer(x, ws_ref, fcw_ref, fcb_ref):
        # x: (N, D_in) stacked [user; movie] features -> (N, D_out)
        n_nodes = x.shape[0]
        m = ws_ref.shape[1] // r_count
        xs = x * c_all                               # source-side norm (hoisted)
        # one wide feature matmul for all ratings: (N, R*M)
        h = jnp.dot(xs, ws_ref[...], preferred_element_type=jnp.float32)
        hb = h.astype(jnp.bfloat16)                  # bf16 MXU operand, f32 acc
        agg_u = jnp.zeros((nu, m), jnp.float32)
        agg_m = jnp.zeros((n_nodes - nu, m), jnp.float32)
        for r in range(r_count):                     # static, R is small
            hr = hb[:, r * m:(r + 1) * m]
            # two rectangular message matmuls (no zero-padded block adjacency)
            agg_u = agg_u + jnp.dot(adj_ref[r], hr[nu:, :],
                                    preferred_element_type=jnp.float32)
            agg_m = agg_m + jnp.dot(adjt_ref[r], hr[:nu, :],
                                    preferred_element_type=jnp.float32)
        agg = jnp.concatenate([agg_u, agg_m], axis=0) * c_all   # dest-side norm
        act = jnp.where(agg > 0, agg, slope * agg)   # f32 LeakyReLU(0.1); dropout=id (eval)
        return (jnp.dot(act, fcw_ref[...], preferred_element_type=jnp.float32)
                + fcb_ref[...])

    out0 = gcmc_layer(feat0_ref[...], w0s_ref, fcw0_ref, fcb0_ref)
    out1 = gcmc_layer(out0, w1s_ref, fcw1_ref, fcb1_ref)
    node_out = out0 + 0.5 * out1                     # user_out/movie_out accumulation
    node_out_ref[...] = node_out                     # single lane-packed slab

    # ------------------------------ BiDecoder ------------------------------ #
    num_e, dout = ue_ref.shape

    # O(E*Dout) edge gather: SMEM indices drive dynamic row copies from the
    # VMEM node_out slab into (E, Dout) scratch (no one-hot, no HBM round trip).
    @pl.loop(0, num_e)
    def _(e):
        u = uidx_ref[e]
        mi = midx_ref[e]
        ue_ref[pl.ds(e, 1), :] = node_out_ref[pl.ds(u, 1), :]
        me_ref[pl.ds(e, 1), :] = node_out_ref[pl.ds(nu + mi, 1), :]

    ue = ue_ref[...]                                 # (E, Dout)
    me = me_ref[...]                                 # (E, Dout)
    k_basis = psflat_ref.shape[1] // dout
    combt = combt_ref[...]                           # (K, 128) zero-padded classes
    g = jnp.dot(ue, psflat_ref[...], preferred_element_type=jnp.float32)  # (E, K*Dout)
    pred = jnp.zeros(pred_ref.shape, jnp.float32)    # (E, 128) lane-dense
    for k in range(k_basis):
        sk = jnp.sum(g[:, k * dout:(k + 1) * dout] * me,
                     axis=1, keepdims=True)          # (E, 1): u^T P_k m per edge
        pred = pred + sk * combt[k:k + 1, :]         # combine_basis (padded cols)
    pred_ref[...] = pred

    # ----- reg loss: -sum_{i>0} sum_rows cos_sim(W[i], W[i-1], dim=1) ------- #
    m0 = w0s_ref.shape[1] // r_count
    w0_all = w0s_ref[...]                            # (Din, R*M0) stacked layer-0 W
    eps = jnp.float32(1e-8)
    loss = jnp.float32(0.0)
    prev = w0_all[:, 0:m0]
    n_prev = jnp.sqrt(jnp.sum(prev * prev, axis=1, keepdims=True))
    for i in range(1, r_count):
        cur = w0_all[:, i * m0:(i + 1) * m0]
        n_cur = jnp.sqrt(jnp.sum(cur * cur, axis=1, keepdims=True))
        d = jnp.sum(cur * prev, axis=1, keepdims=True)
        # F.cosine_similarity clamps each norm separately.
        cos = d / (jnp.maximum(n_cur, eps) * jnp.maximum(n_prev, eps))
        loss = loss - jnp.sum(cos)
        prev, n_prev = cur, n_cur                    # carry norm, no recompute
    loss_ref[0, 0] = loss                            # scalar -> SMEM


# -------------------------------- wrapper ----------------------------------- #

_VMEM = pl.BlockSpec(memory_space=pltpu.MemorySpace.VMEM)
_SMEM = pl.BlockSpec(memory_space=pltpu.MemorySpace.SMEM)


def net_forward(params, adj, cu, cm, ufeat, ifeat, u_idx, m_idx):
    enc0, enc1 = params["enc"]
    R, Nu, Nm = adj.shape
    N = Nu + Nm
    Dout = enc0["fcw_t"].shape[1]
    E = u_idx.shape[0]
    num_classes = params["dec"]["combT"].shape[1]
    K = params["dec"]["Ps"].shape[0]
    ncls_pad = max(128, ((num_classes + 127) // 128) * 128)

    # ---- tiny one-time parameter / layout preprocessing (glue, XLA) ----
    W0 = jnp.einsum("rb,bdm->rdm", enc0["att"], enc0["basis"])      # (R, Din, M0)
    W1 = jnp.einsum("rb,bdm->rdm", enc1["att"], enc1["basis"])      # (R, Dout, M1)
    M0 = W0.shape[2]
    M1 = W1.shape[2]
    w0_stk = jnp.transpose(W0, (1, 0, 2)).reshape(W0.shape[1], R * M0)   # (Din, R*M0)
    w1_stk = jnp.transpose(W1, (1, 0, 2)).reshape(W1.shape[1], R * M1)   # (Dout, R*M1)
    adj_bf = adj.astype(jnp.bfloat16)                               # (R, Nu, Nm)
    adjT_bf = jnp.swapaxes(adj, 1, 2).astype(jnp.bfloat16)          # (R, Nm, Nu)
    feat0 = jnp.concatenate([ufeat, ifeat], axis=0)                 # (N, Din)
    c_all = jnp.concatenate([cu, cm], axis=0)                       # (N, 1)
    Ps = params["dec"]["Ps"]                                        # (K, Dout, Dout)
    ps_flat = jnp.transpose(Ps, (1, 0, 2)).reshape(Dout, K * Dout)  # (Dout, K*Dout)
    combt_pad = jnp.pad(params["dec"]["combT"],                     # (K, 128)
                        ((0, 0), (0, ncls_pad - num_classes)))
    uidx = u_idx.astype(jnp.int32)
    midx = m_idx.astype(jnp.int32)

    node_out, pred_pad, loss = pl.pallas_call(
        functools.partial(_net_fused_kernel, nu=Nu),
        out_shape=(jax.ShapeDtypeStruct((N, Dout), jnp.float32),
                   jax.ShapeDtypeStruct((E, ncls_pad), jnp.float32),
                   jax.ShapeDtypeStruct((1, 1), jnp.float32)),
        in_specs=[_VMEM] * 12 + [_SMEM, _SMEM],
        out_specs=(_VMEM, _VMEM, _SMEM),
        scratch_shapes=[pltpu.VMEM((E, Dout), jnp.float32),
                        pltpu.VMEM((E, Dout), jnp.float32)],
        compiler_params=pltpu.CompilerParams(vmem_limit_bytes=32 * 1024 * 1024),
    )(feat0, c_all, adj_bf, adjT_bf,
      w0_stk, enc0["fcw_t"], enc0["fcb"],
      w1_stk, enc1["fcw_t"], enc1["fcb"],
      ps_flat, combt_pad, uidx, midx)

    user_out = node_out[:Nu]
    movie_out = node_out[Nu:]
    pred_ratings = pred_pad[:, :num_classes]
    reg_loss = loss[0, 0]
    return pred_ratings, reg_loss, user_out, movie_out, W0


# ------------------------------ param / data -------------------------------- #

def init_params(key):
    R, B = 3, 4                    # len(rating_vals), basis_units
    D_in = 16                      # src_in_units == dst_in_units (shared params)
    M0 = 24                        # gcn_agg_units
    Dout = 32                      # gcn_out_units
    ks = jax.random.split(key, 10)
    enc0 = dict(
        att=0.1 * jax.random.normal(ks[0], (R, B), jnp.float32),
        basis=0.1 * jax.random.normal(ks[1], (B, D_in, M0), jnp.float32),
        fcw_t=0.1 * jax.random.normal(ks[2], (M0, Dout), jnp.float32),   # ufc weight^T
        fcb=0.1 * jax.random.normal(ks[3], (1, Dout), jnp.float32),
    )
    enc1 = dict(
        att=0.1 * jax.random.normal(ks[4], (R, B), jnp.float32),
        basis=0.1 * jax.random.normal(ks[5], (B, Dout, Dout), jnp.float32),
        fcw_t=0.1 * jax.random.normal(ks[6], (Dout, Dout), jnp.float32),
        fcb=0.1 * jax.random.normal(ks[7], (1, Dout), jnp.float32),
    )
    dec = dict(
        Ps=0.1 * jax.random.normal(ks[8], (2, Dout, Dout), jnp.float32),   # num_basis=2
        combT=0.1 * jax.random.normal(ks[9], (2, R), jnp.float32),         # combine_basis.weight^T
    )
    return {"enc": [enc0, enc1], "dec": dec}


if __name__ == "__main__":
    key = jax.random.PRNGKey(0)
    k_par, k_adj, k_uf, k_if, k_eu, k_em = jax.random.split(key, 6)

    R, Nu, Nm, D_in, E = 3, 16, 16, 16, 32
    params = init_params(k_par)

    # enc_graph as dense per-rating adjacency (R, Nu, Nm).
    adj = (jax.random.uniform(k_adj, (R, Nu, Nm)) < 0.3).astype(jnp.float32)
    # DGL graph degree norms (ci/cj) computed in glue from the dense adjacency.
    deg_u = jnp.maximum(jnp.sum(adj, axis=(0, 2)), 1.0)
    deg_m = jnp.maximum(jnp.sum(adj, axis=(0, 1)), 1.0)
    cu = (1.0 / jnp.sqrt(deg_u)).reshape(Nu, 1).astype(jnp.float32)
    cm = (1.0 / jnp.sqrt(deg_m)).reshape(Nm, 1).astype(jnp.float32)

    ufeat = jax.random.normal(k_uf, (Nu, D_in), jnp.float32)
    ifeat = jax.random.normal(k_if, (Nm, D_in), jnp.float32)

    # dec_graph edges (user, movie) pairs to score.
    u_idx = jax.random.randint(k_eu, (E,), 0, Nu)
    m_idx = jax.random.randint(k_em, (E,), 0, Nm)

    fwd = jax.jit(net_forward)
    pred_ratings, reg_loss, user_out, movie_out, W = fwd(
        params, adj, cu, cm, ufeat, ifeat, u_idx, m_idx)
    jax.block_until_ready((pred_ratings, reg_loss, user_out, movie_out, W))

    assert pred_ratings.shape == (E, R)
    assert user_out.shape == (Nu, 32) and movie_out.shape == (Nm, 32)
    assert W.shape == (R, D_in, 24)
    assert reg_loss.shape == ()
    print("KERNEL_OK")
</pallas_src>

<mosaic_0001>
module attributes {stable_mosaic.version = 11 : i64} {
  func.func @_net_fused_kernel(%arg0: memref<32x16xf32, #tpu.memory_space<vmem>>, %arg1: memref<32x1xf32, #tpu.memory_space<vmem>>, %arg2: memref<3x16x16xbf16, #tpu.memory_space<vmem>>, %arg3: memref<3x16x16xbf16, #tpu.memory_space<vmem>>, %arg4: memref<16x72xf32, #tpu.memory_space<vmem>>, %arg5: memref<24x32xf32, #tpu.memory_space<vmem>>, %arg6: memref<1x32xf32, #tpu.memory_space<vmem>>, %arg7: memref<32x96xf32, #tpu.memory_space<vmem>>, %arg8: memref<32x32xf32, #tpu.memory_space<vmem>>, %arg9: memref<1x32xf32, #tpu.memory_space<vmem>>, %arg10: memref<32x64xf32, #tpu.memory_space<vmem>>, %arg11: memref<2x128xf32, #tpu.memory_space<vmem>>, %arg12: memref<32xi32, #tpu.memory_space<smem>>, %arg13: memref<32xi32, #tpu.memory_space<smem>>, %arg14: memref<32x32xf32, #tpu.memory_space<vmem>>, %arg15: memref<32x128xf32, #tpu.memory_space<vmem>>, %arg16: memref<1x1xf32, #tpu.memory_space<smem>>, %arg17: memref<32x32xf32, #tpu.memory_space<vmem>>, %arg18: memref<32x32xf32, #tpu.memory_space<vmem>>) attributes {dimension_semantics = [], scalar_prefetch = 0 : i64, scratch_operands = 2 : i64, tpu.core_type = #tpu.core_type<tc>} {
    %c0 = arith.constant 0 : index
    %c0_0 = arith.constant 0 : index
    %0 = vector.load %arg1[%c0, %c0_0] : memref<32x1xf32, #tpu.memory_space<vmem>>, vector<32x1xf32>
    %c0_1 = arith.constant 0 : index
    %c0_2 = arith.constant 0 : index
    %1 = vector.load %arg0[%c0_1, %c0_2] : memref<32x16xf32, #tpu.memory_space<vmem>>, vector<32x16xf32>
    %2 = vector.broadcast %0 : vector<32x1xf32> to vector<32x16xf32>
    %3 = arith.mulf %1, %2 : vector<32x16xf32>
    %c0_3 = arith.constant 0 : index
    %c0_4 = arith.constant 0 : index
    %4 = vector.load %arg4[%c0_3, %c0_4] : memref<16x72xf32, #tpu.memory_space<vmem>>, vector<16x72xf32>
    %cst = arith.constant dense<0.000000e+00> : vector<32x72xf32>
    %5 = tpu.matmul %3, %4, %cst {dimension_numbers = #tpu.dot_dimension_numbers<[1], [0], [0], [1], [0, 0, 1, 1], [], []>} : vector<32x16xf32>, vector<16x72xf32>, vector<32x72xf32> -> vector<32x72xf32>
    %6 = arith.truncf %5 : vector<32x72xf32> to vector<32x72xbf16>
    %cst_5 = arith.constant 0.000000e+00 : f32
    %7 = vector.broadcast %cst_5 : f32 to vector<16x24xf32>
    %cst_6 = arith.constant 0.000000e+00 : f32
    %8 = vector.broadcast %cst_6 : f32 to vector<16x24xf32>
    %9 = vector.extract_strided_slice %6 {offsets = [0, 0], sizes = [32, 24], strides = [1, 1]} : vector<32x72xbf16> to vector<32x24xbf16>
    %c0_7 = arith.constant 0 : index
    %c0_8 = arith.constant 0 : index
    %c0_9 = arith.constant 0 : index
    %10 = vector.load %arg2[%c0_7, %c0_8, %c0_9] : memref<3x16x16xbf16, #tpu.memory_space<vmem>>, vector<1x16x16xbf16>
    %11 = vector.shape_cast %10 : vector<1x16x16xbf16> to vector<16x16xbf16>
    %12 = vector.extract_strided_slice %9 {offsets = [16, 0], sizes = [16, 24], strides = [1, 1]} : vector<32x24xbf16> to vector<16x24xbf16>
    %cst_10 = arith.constant dense<0.000000e+00> : vector<16x24xf32>
    %13 = tpu.matmul %11, %12, %cst_10 {dimension_numbers = #tpu.dot_dimension_numbers<[1], [0], [0], [1], [0, 0, 1, 1], [], []>} : vector<16x16xbf16>, vector<16x24xbf16>, vector<16x24xf32> -> vector<16x24xf32>
    %14 = arith.addf %7, %13 : vector<16x24xf32>
    %c0_11 = arith.constant 0 : index
    %c0_12 = arith.constant 0 : index
    %c0_13 = arith.constant 0 : index
    %15 = vector.load %arg3[%c0_11, %c0_12, %c0_13] : memref<3x16x16xbf16, #tpu.memory_space<vmem>>, vector<1x16x16xbf16>
    %16 = vector.shape_cast %15 : vector<1x16x16xbf16> to vector<16x16xbf16>
    %17 = vector.extract_strided_slice %9 {offsets = [0, 0], sizes = [16, 24], strides = [1, 1]} : vector<32x24xbf16> to vector<16x24xbf16>
    %cst_14 = arith.constant dense<0.000000e+00> : vector<16x24xf32>
    %18 = tpu.matmul %16, %17, %cst_14 {dimension_numbers = #tpu.dot_dimension_numbers<[1], [0], [0], [1], [0, 0, 1, 1], [], []>} : vector<16x16xbf16>, vector<16x24xbf16>, vector<16x24xf32> -> vector<16x24xf32>
    %19 = arith.addf %8, %18 : vector<16x24xf32>
    %20 = vector.extract_strided_slice %6 {offsets = [0, 24], sizes = [32, 24], strides = [1, 1]} : vector<32x72xbf16> to vector<32x24xbf16>
    %c1 = arith.constant 1 : index
    %c0_15 = arith.constant 0 : index
    %c0_16 = arith.constant 0 : index
    %21 = vector.load %arg2[%c1, %c0_15, %c0_16] : memref<3x16x16xbf16, #tpu.memory_space<vmem>>, vector<1x16x16xbf16>
    %22 = vector.shape_cast %21 : vector<1x16x16xbf16> to vector<16x16xbf16>
    %23 = vector.extract_strided_slice %20 {offsets = [16, 0], sizes = [16, 24], strides = [1, 1]} : vector<32x24xbf16> to vector<16x24xbf16>
    %cst_17 = arith.constant dense<0.000000e+00> : vector<16x24xf32>
    %24 = tpu.matmul %22, %23, %cst_17 {dimension_numbers = #tpu.dot_dimension_numbers<[1], [0], [0], [1], [0, 0, 1, 1], [], []>} : vector<16x16xbf16>, vector<16x24xbf16>, vector<16x24xf32> -> vector<16x24xf32>
    %25 = arith.addf %14, %24 : vector<16x24xf32>
    %c1_18 = arith.constant 1 : index
    %c0_19 = arith.constant 0 : index
    %c0_20 = arith.constant 0 : index
    %26 = vector.load %arg3[%c1_18, %c0_19, %c0_20] : memref<3x16x16xbf16, #tpu.memory_space<vmem>>, vector<1x16x16xbf16>
    %27 = vector.shape_cast %26 : vector<1x16x16xbf16> to vector<16x16xbf16>
    %28 = vector.extract_strided_slice %20 {offsets = [0, 0], sizes = [16, 24], strides = [1, 1]} : vector<32x24xbf16> to vector<16x24xbf16>
    %cst_21 = arith.constant dense<0.000000e+00> : vector<16x24xf32>
    %29 = tpu.matmul %27, %28, %cst_21 {dimension_numbers = #tpu.dot_dimension_numbers<[1], [0], [0], [1], [0, 0, 1, 1], [], []>} : vector<16x16xbf16>, vector<16x24xbf16>, vector<16x24xf32> -> vector<16x24xf32>
    %30 = arith.addf %19, %29 : vector<16x24xf32>
    %31 = vector.extract_strided_slice %6 {offsets = [0, 48], sizes = [32, 24], strides = [1, 1]} : vector<32x72xbf16> to vector<32x24xbf16>
    %c2 = arith.constant 2 : index
    %c0_22 = arith.constant 0 : index
    %c0_23 = arith.constant 0 : index
    %32 = vector.load %arg2[%c2, %c0_22, %c0_23] : memref<3x16x16xbf16, #tpu.memory_space<vmem>>, vector<1x16x16xbf16>
    %33 = vector.shape_cast %32 : vector<1x16x16xbf16> to vector<16x16xbf16>
    %34 = vector.extract_strided_slice %31 {offsets = [16, 0], sizes = [16, 24], strides = [1, 1]} : vector<32x24xbf16> to vector<16x24xbf16>
    %cst_24 = arith.constant dense<0.000000e+00> : vector<16x24xf32>
    %35 = tpu.matmul %33, %34, %cst_24 {dimension_numbers = #tpu.dot_dimension_numbers<[1], [0], [0], [1], [0, 0, 1, 1], [], []>} : vector<16x16xbf16>, vector<16x24xbf16>, vector<16x24xf32> -> vector<16x24xf32>
    %36 = arith.addf %25, %35 : vector<16x24xf32>
    %c2_25 = arith.constant 2 : index
    %c0_26 = arith.constant 0 : index
    %c0_27 = arith.constant 0 : index
    %37 = vector.load %arg3[%c2_25, %c0_26, %c0_27] : memref<3x16x16xbf16, #tpu.memory_space<vmem>>, vector<1x16x16xbf16>
    %38 = vector.shape_cast %37 : vector<1x16x16xbf16> to vector<16x16xbf16>
    %39 = vector.extract_strided_slice %31 {offsets = [0, 0], sizes = [16, 24], strides = [1, 1]} : vector<32x24xbf16> to vector<16x24xbf16>
    %cst_28 = arith.constant dense<0.000000e+00> : vector<16x24xf32>
    %40 = tpu.matmul %38, %39, %cst_28 {dimension_numbers = #tpu.dot_dimension_numbers<[1], [0], [0], [1], [0, 0, 1, 1], [], []>} : vector<16x16xbf16>, vector<16x24xbf16>, vector<16x24xf32> -> vector<16x24xf32>
    %41 = arith.addf %30, %40 : vector<16x24xf32>
    %42 = tpu.concatenate %36, %41 in 0 : vector<16x24xf32>, vector<16x24xf32> -> vector<32x24xf32>
    %43 = vector.broadcast %0 : vector<32x1xf32> to vector<32x24xf32>
    %44 = arith.mulf %42, %43 : vector<32x24xf32>
    %cst_29 = arith.constant 0.000000e+00 : f32
    %45 = vector.broadcast %cst_29 : f32 to vector<32x24xf32>
    %46 = arith.cmpf ogt, %44, %45 : vector<32x24xf32>
    %cst_30 = arith.constant 1.000000e-01 : f32
    %47 = vector.broadcast %cst_30 : f32 to vector<32x24xf32>
    %48 = arith.mulf %47, %44 : vector<32x24xf32>
    %49 = arith.select %46, %44, %48 : vector<32x24xi1>, vector<32x24xf32>
    %c0_31 = arith.constant 0 : index
    %c0_32 = arith.constant 0 : index
    %50 = vector.load %arg5[%c0_31, %c0_32] : memref<24x32xf32, #tpu.memory_space<vmem>>, vector<24x32xf32>
    %cst_33 = arith.constant dense<0.000000e+00> : vector<32x32xf32>
    %51 = tpu.matmul %49, %50, %cst_33 {dimension_numbers = #tpu.dot_dimension_numbers<[1], [0], [0], [1], [0, 0, 1, 1], [], []>} : vector<32x24xf32>, vector<24x32xf32>, vector<32x32xf32> -> vector<32x32xf32>
    %c0_34 = arith.constant 0 : index
    %c0_35 = arith.constant 0 : index
    %52 = vector.load %arg6[%c0_34, %c0_35] : memref<1x32xf32, #tpu.memory_space<vmem>>, vector<1x32xf32>
    %53 = vector.broadcast %52 : vector<1x32xf32> to vector<32x32xf32>
    %54 = arith.addf %51, %53 : vector<32x32xf32>
    %55 = vector.broadcast %0 : vector<32x1xf32> to vector<32x32xf32>
    %56 = arith.mulf %54, %55 : vector<32x32xf32>
    %c0_36 = arith.constant 0 : index
    %c0_37 = arith.constant 0 : index
    %57 = vector.load %arg7[%c0_36, %c0_37] : memref<32x96xf32, #tpu.memory_space<vmem>>, vector<32x96xf32>
    %cst_38 = arith.constant dense<0.000000e+00> : vector<32x96xf32>
    %58 = tpu.matmul %56, %57, %cst_38 {dimension_numbers = #tpu.dot_dimension_numbers<[1], [0], [0], [1], [0, 0, 1, 1], [], []>} : vector<32x32xf32>, vector<32x96xf32>, vector<32x96xf32> -> vector<32x96xf32>
    %59 = arith.truncf %58 : vector<32x96xf32> to vector<32x96xbf16>
    %cst_39 = arith.constant 0.000000e+00 : f32
    %60 = vector.broadcast %cst_39 : f32 to vector<16x32xf32>
    %cst_40 = arith.constant 0.000000e+00 : f32
    %61 = vector.broadcast %cst_40 : f32 to vector<16x32xf32>
    %62 = vector.extract_strided_slice %59 {offsets = [0, 0], sizes = [32, 32], strides = [1, 1]} : vector<32x96xbf16> to vector<32x32xbf16>
    %c0_41 = arith.constant 0 : index
    %c0_42 = arith.constant 0 : index
    %c0_43 = arith.constant 0 : index
    %63 = vector.load %arg2[%c0_41, %c0_42, %c0_43] : memref<3x16x16xbf16, #tpu.memory_space<vmem>>, vector<1x16x16xbf16>
    %64 = vector.shape_cast %63 : vector<1x16x16xbf16> to vector<16x16xbf16>
    %65 = vector.extract_strided_slice %62 {offsets = [16, 0], sizes = [16, 32], strides = [1, 1]} : vector<32x32xbf16> to vector<16x32xbf16>
    %cst_44 = arith.constant dense<0.000000e+00> : vector<16x32xf32>
    %66 = tpu.matmul %64, %65, %cst_44 {dimension_numbers = #tpu.dot_dimension_numbers<[1], [0], [0], [1], [0, 0, 1, 1], [], []>} : vector<16x16xbf16>, vector<16x32xbf16>, vector<16x32xf32> -> vector<16x32xf32>
    %67 = arith.addf %60, %66 : vector<16x32xf32>
    %c0_45 = arith.constant 0 : index
    %c0_46 = arith.constant 0 : index
    %c0_47 = arith.constant 0 : index
    %68 = vector.load %arg3[%c0_45, %c0_46, %c0_47] : memref<3x16x16xbf16, #tpu.memory_space<vmem>>, vector<1x16x16xbf16>
    %69 = vector.shape_cast %68 : vector<1x16x16xbf16> to vector<16x16xbf16>
    %70 = vector.extract_strided_slice %62 {offsets = [0, 0], sizes = [16, 32], strides = [1, 1]} : vector<32x32xbf16> to vector<16x32xbf16>
    %cst_48 = arith.constant dense<0.000000e+00> : vector<16x32xf32>
    %71 = tpu.matmul %69, %70, %cst_48 {dimension_numbers = #tpu.dot_dimension_numbers<[1], [0], [0], [1], [0, 0, 1, 1], [], []>} : vector<16x16xbf16>, vector<16x32xbf16>, vector<16x32xf32> -> vector<16x32xf32>
    %72 = arith.addf %61, %71 : vector<16x32xf32>
    %73 = vector.extract_strided_slice %59 {offsets = [0, 32], sizes = [32, 32], strides = [1, 1]} : vector<32x96xbf16> to vector<32x32xbf16>
    %c1_49 = arith.constant 1 : index
    %c0_50 = arith.constant 0 : index
    %c0_51 = arith.constant 0 : index
    %74 = vector.load %arg2[%c1_49, %c0_50, %c0_51] : memref<3x16x16xbf16, #tpu.memory_space<vmem>>, vector<1x16x16xbf16>
    %75 = vector.shape_cast %74 : vector<1x16x16xbf16> to vector<16x16xbf16>
    %76 = vector.extract_strided_slice %73 {offsets = [16, 0], sizes = [16, 32], strides = [1, 1]} : vector<32x32xbf16> to vector<16x32xbf16>
    %cst_52 = arith.constant dense<0.000000e+00> : vector<16x32xf32>
    %77 = tpu.matmul %75, %76, %cst_52 {dimension_numbers = #tpu.dot_dimension_numbers<[1], [0], [0], [1], [0, 0, 1, 1], [], []>} : vector<16x16xbf16>, vector<16x32xbf16>, vector<16x32xf32> -> vector<16x32xf32>
    %78 = arith.addf %67, %77 : vector<16x32xf32>
    %c1_53 = arith.constant 1 : index
    %c0_54 = arith.constant 0 : index
    %c0_55 = arith.constant 0 : index
    %79 = vector.load %arg3[%c1_53, %c0_54, %c0_55] : memref<3x16x16xbf16, #tpu.memory_space<vmem>>, vector<1x16x16xbf16>
    %80 = vector.shape_cast %79 : vector<1x16x16xbf16> to vector<16x16xbf16>
    %81 = vector.extract_strided_slice %73 {offsets = [0, 0], sizes = [16, 32], strides = [1, 1]} : vector<32x32xbf16> to vector<16x32xbf16>
    %cst_56 = arith.constant dense<0.000000e+00> : vector<16x32xf32>
    %82 = tpu.matmul %80, %81, %cst_56 {dimension_numbers = #tpu.dot_dimension_numbers<[1], [0], [0], [1], [0, 0, 1, 1], [], []>} : vector<16x16xbf16>, vector<16x32xbf16>, vector<16x32xf32> -> vector<16x32xf32>
    %83 = arith.addf %72, %82 : vector<16x32xf32>
    %84 = vector.extract_strided_slice %59 {offsets = [0, 64], sizes = [32, 32], strides = [1, 1]} : vector<32x96xbf16> to vector<32x32xbf16>
    %c2_57 = arith.constant 2 : index
    %c0_58 = arith.constant 0 : index
    %c0_59 = arith.constant 0 : index
    %85 = vector.load %arg2[%c2_57, %c0_58, %c0_59] : memref<3x16x16xbf16, #tpu.memory_space<vmem>>, vector<1x16x16xbf16>
    %86 = vector.shape_cast %85 : vector<1x16x16xbf16> to vector<16x16xbf16>
    %87 = vector.extract_strided_slice %84 {offsets = [16, 0], sizes = [16, 32], strides = [1, 1]} : vector<32x32xbf16> to vector<16x32xbf16>
    %cst_60 = arith.constant dense<0.000000e+00> : vector<16x32xf32>
    %88 = tpu.matmul %86, %87, %cst_60 {dimension_numbers = #tpu.dot_dimension_numbers<[1], [0], [0], [1], [0, 0, 1, 1], [], []>} : vector<16x16xbf16>, vector<16x32xbf16>, vector<16x32xf32> -> vector<16x32xf32>
    %89 = arith.addf %78, %88 : vector<16x32xf32>
    %c2_61 = arith.constant 2 : index
    %c0_62 = arith.constant 0 : index
    %c0_63 = arith.constant 0 : index
    %90 = vector.load %arg3[%c2_61, %c0_62, %c0_63] : memref<3x16x16xbf16, #tpu.memory_space<vmem>>, vector<1x16x16xbf16>
    %91 = vector.shape_cast %90 : vector<1x16x16xbf16> to vector<16x16xbf16>
    %92 = vector.extract_strided_slice %84 {offsets = [0, 0], sizes = [16, 32], strides = [1, 1]} : vector<32x32xbf16> to vector<16x32xbf16>
    %cst_64 = arith.constant dense<0.000000e+00> : vector<16x32xf32>
    %93 = tpu.matmul %91, %92, %cst_64 {dimension_numbers = #tpu.dot_dimension_numbers<[1], [0], [0], [1], [0, 0, 1, 1], [], []>} : vector<16x16xbf16>, vector<16x32xbf16>, vector<16x32xf32> -> vector<16x32xf32>
    %94 = arith.addf %83, %93 : vector<16x32xf32>
    %95 = tpu.concatenate %89, %94 in 0 : vector<16x32xf32>, vector<16x32xf32> -> vector<32x32xf32>
    %96 = vector.broadcast %0 : vector<32x1xf32> to vector<32x32xf32>
    %97 = arith.mulf %95, %96 : vector<32x32xf32>
    %cst_65 = arith.constant 0.000000e+00 : f32
    %98 = vector.broadcast %cst_65 : f32 to vector<32x32xf32>
    %99 = arith.cmpf ogt, %97, %98 : vector<32x32xf32>
    %cst_66 = arith.constant 1.000000e-01 : f32
    %100 = vector.broadcast %cst_66 : f32 to vector<32x32xf32>
    %101 = arith.mulf %100, %97 : vector<32x32xf32>
    %102 = arith.select %99, %97, %101 : vector<32x32xi1>, vector<32x32xf32>
    %c0_67 = arith.constant 0 : index
    %c0_68 = arith.constant 0 : index
    %103 = vector.load %arg8[%c0_67, %c0_68] : memref<32x32xf32, #tpu.memory_space<vmem>>, vector<32x32xf32>
    %cst_69 = arith.constant dense<0.000000e+00> : vector<32x32xf32>
    %104 = tpu.matmul %102, %103, %cst_69 {dimension_numbers = #tpu.dot_dimension_numbers<[1], [0], [0], [1], [0, 0, 1, 1], [], []>} : vector<32x32xf32>, vector<32x32xf32>, vector<32x32xf32> -> vector<32x32xf32>
    %c0_70 = arith.constant 0 : index
    %c0_71 = arith.constant 0 : index
    %105 = vector.load %arg9[%c0_70, %c0_71] : memref<1x32xf32, #tpu.memory_space<vmem>>, vector<1x32xf32>
    %106 = vector.broadcast %105 : vector<1x32xf32> to vector<32x32xf32>
    %107 = arith.addf %104, %106 : vector<32x32xf32>
    %cst_72 = arith.constant 5.000000e-01 : f32
    %108 = vector.broadcast %cst_72 : f32 to vector<32x32xf32>
    %109 = arith.mulf %108, %107 : vector<32x32xf32>
    %110 = arith.addf %54, %109 : vector<32x32xf32>
    %c0_73 = arith.constant 0 : index
    %c0_74 = arith.constant 0 : index
    %111 = vector.load %arg14[%c0_73, %c0_74] : memref<32x32xf32, #tpu.memory_space<vmem>>, vector<32x32xf32>
    tpu.vector_store %arg14[%c0_73, %c0_74], %110 {strides = array<i32>} : memref<32x32xf32, #tpu.memory_space<vmem>>, vector<32x32xf32>,
    %c0_i32 = arith.constant 0 : i32
    %c32_i32 = arith.constant 32 : i32
    %112 = arith.addi %c0_i32, %c32_i32 : i32
    %c1_i32 = arith.constant 1 : i32
    scf.for %arg19 = %c0_i32 to %112 step %c1_i32  : i32 {
      %c1_i32_106 = arith.constant 1 : i32
      %183 = arith.muli %arg19, %c1_i32_106 : i32
      %c0_i32_107 = arith.constant 0 : i32
      %184 = arith.addi %c0_i32_107, %183 : i32
      %185 = arith.index_cast %184 : i32 to index
      %186 = memref.load %arg12[%185] : memref<32xi32, #tpu.memory_space<smem>>
      %187 = arith.index_cast %184 : i32 to index
      %188 = memref.load %arg13[%187] : memref<32xi32, #tpu.memory_space<smem>>
      %189 = arith.index_cast %186 : i32 to index
      %c0_108 = arith.constant 0 : index
      %190 = vector.load %arg14[%189, %c0_108] : memref<32x32xf32, #tpu.memory_space<vmem>>, vector<1x32xf32>
      %191 = arith.index_cast %184 : i32 to index
      %c0_109 = arith.constant 0 : index
      %192 = vector.load %arg17[%191, %c0_109] : memref<32x32xf32, #tpu.memory_space<vmem>>, vector<1x32xf32>
      tpu.vector_store %arg17[%191, %c0_109], %190 {strides = array<i32>} : memref<32x32xf32, #tpu.memory_space<vmem>>, vector<1x32xf32>,
      %c16_i32 = arith.constant 16 : i32
      %193 = arith.addi %c16_i32, %188 : i32
      %194 = arith.index_cast %193 : i32 to index
      %c0_110 = arith.constant 0 : index
      %195 = vector.load %arg14[%194, %c0_110] : memref<32x32xf32, #tpu.memory_space<vmem>>, vector<1x32xf32>
      %196 = arith.index_cast %184 : i32 to index
      %c0_111 = arith.constant 0 : index
      %197 = vector.load %arg18[%196, %c0_111] : memref<32x32xf32, #tpu.memory_space<vmem>>, vector<1x32xf32>
      tpu.vector_store %arg18[%196, %c0_111], %195 {strides = array<i32>} : memref<32x32xf32, #tpu.memory_space<vmem>>, vector<1x32xf32>,
    }
    %c32_i32_75 = arith.constant 32 : i32
    %c0_76 = arith.constant 0 : index
    %c0_77 = arith.constant 0 : index
    %113 = vector.load %arg17[%c0_76, %c0_77] : memref<32x32xf32, #tpu.memory_space<vmem>>, vector<32x32xf32>
    %c0_78 = arith.constant 0 : index
    %c0_79 = arith.constant 0 : index
    %114 = vector.load %arg18[%c0_78, %c0_79] : memref<32x32xf32, #tpu.memory_space<vmem>>, vector<32x32xf32>
    %c0_80 = arith.constant 0 : index
    %c0_81 = arith.constant 0 : index
    %115 = vector.load %arg11[%c0_80, %c0_81] : memref<2x128xf32, #tpu.memory_space<vmem>>, vector<2x128xf32>
    %c0_82 = arith.constant 0 : index
    %c0_83 = arith.constant 0 : index
    %116 = vector.load %arg10[%c0_82, %c0_83] : memref<32x64xf32, #tpu.memory_space<vmem>>, vector<32x64xf32>
    %cst_84 = arith.constant dense<0.000000e+00> : vector<32x64xf32>
    %117 = tpu.matmul %113, %116, %cst_84 {dimension_numbers = #tpu.dot_dimension_numbers<[1], [0], [0], [1], [0, 0, 1, 1], [], []>} : vector<32x32xf32>, vector<32x64xf32>, vector<32x64xf32> -> vector<32x64xf32>
    %cst_85 = arith.constant 0.000000e+00 : f32
    %118 = vector.broadcast %cst_85 : f32 to vector<32x128xf32>
    %119 = vector.extract_strided_slice %117 {offsets = [0, 0], sizes = [32, 32], strides = [1, 1]} : vector<32x64xf32> to vector<32x32xf32>
    %120 = arith.mulf %119, %114 : vector<32x32xf32>
    %cst_86 = arith.constant dense<0.000000e+00> : vector<32xf32>
    %121 = vector.multi_reduction <add>, %120, %cst_86 [1] : vector<32x32xf32> to vector<32xf32>
    %122 = vector.shape_cast %121 : vector<32xf32> to vector<32x1xf32>
    %123 = vector.extract_strided_slice %115 {offsets = [0, 0], sizes = [1, 128], strides = [1, 1]} : vector<2x128xf32> to vector<1x128xf32>
    %124 = vector.broadcast %122 : vector<32x1xf32> to vector<32x128xf32>
    %125 = vector.broadcast %123 : vector<1x128xf32> to vector<32x128xf32>
    %126 = arith.mulf %124, %125 : vector<32x128xf32>
    %127 = arith.addf %118, %126 : vector<32x128xf32>
    %128 = vector.extract_strided_slice %117 {offsets = [0, 32], sizes = [32, 32], strides = [1, 1]} : vector<32x64xf32> to vector<32x32xf32>
    %129 = arith.mulf %128, %114 : vector<32x32xf32>
    %cst_87 = arith.constant dense<0.000000e+00> : vector<32xf32>
    %130 = vector.multi_reduction <add>, %129, %cst_87 [1] : vector<32x32xf32> to vector<32xf32>
    %131 = vector.shape_cast %130 : vector<32xf32> to vector<32x1xf32>
    %132 = vector.extract_strided_slice %115 {offsets = [1, 0], sizes = [1, 128], strides = [1, 1]} : vector<2x128xf32> to vector<1x128xf32>
    %133 = vector.broadcast %131 : vector<32x1xf32> to vector<32x128xf32>
    %134 = vector.broadcast %132 : vector<1x128xf32> to vector<32x128xf32>
    %135 = arith.mulf %133, %134 : vector<32x128xf32>
    %136 = arith.addf %127, %135 : vector<32x128xf32>
    %c0_88 = arith.constant 0 : index
    %c0_89 = arith.constant 0 : index
    %137 = vector.load %arg15[%c0_88, %c0_89] : memref<32x128xf32, #tpu.memory_space<vmem>>, vector<32x128xf32>
    tpu.vector_store %arg15[%c0_88, %c0_89], %136 {strides = array<i32>} : memref<32x128xf32, #tpu.memory_space<vmem>>, vector<32x128xf32>,
    %c0_90 = arith.constant 0 : index
    %c0_91 = arith.constant 0 : index
    %138 = vector.load %arg4[%c0_90, %c0_91] : memref<16x72xf32, #tpu.memory_space<vmem>>, vector<16x72xf32>
    %139 = vector.extract_strided_slice %138 {offsets = [0, 0], sizes = [16, 24], strides = [1, 1]} : vector<16x72xf32> to vector<16x24xf32>
    %140 = arith.mulf %139, %139 : vector<16x24xf32>
    %cst_92 = arith.constant dense<0.000000e+00> : vector<16xf32>
    %141 = vector.multi_reduction <add>, %140, %cst_92 [1] : vector<16x24xf32> to vector<16xf32>
    %142 = vector.shape_cast %141 : vector<16xf32> to vector<16x1xf32>
    %143 = math.sqrt %142 : vector<16x1xf32>
    %144 = vector.extract_strided_slice %138 {offsets = [0, 24], sizes = [16, 24], strides = [1, 1]} : vector<16x72xf32> to vector<16x24xf32>
    %145 = arith.mulf %144, %144 : vector<16x24xf32>
    %cst_93 = arith.constant dense<0.000000e+00> : vector<16xf32>
    %146 = vector.multi_reduction <add>, %145, %cst_93 [1] : vector<16x24xf32> to vector<16xf32>
    %147 = vector.shape_cast %146 : vector<16xf32> to vector<16x1xf32>
    %148 = math.sqrt %147 : vector<16x1xf32>
    %149 = arith.mulf %144, %139 : vector<16x24xf32>
    %cst_94 = arith.constant dense<0.000000e+00> : vector<16xf32>
    %150 = vector.multi_reduction <add>, %149, %cst_94 [1] : vector<16x24xf32> to vector<16xf32>
    %151 = vector.shape_cast %150 : vector<16xf32> to vector<16x1xf32>
    %cst_95 = arith.constant 9.99999993E-9 : f32
    %152 = vector.broadcast %cst_95 : f32 to vector<16x1xf32>
    %153 = arith.maximumf %148, %152 : vector<16x1xf32>
    %cst_96 = arith.constant 9.99999993E-9 : f32
    %154 = vector.broadcast %cst_96 : f32 to vector<16x1xf32>
    %155 = arith.maximumf %143, %154 : vector<16x1xf32>
    %156 = arith.mulf %153, %155 : vector<16x1xf32>
    %157 = arith.divf %151, %156 : vector<16x1xf32>
    %158 = vector.shape_cast %157 : vector<16x1xf32> to vector<1x16x1xf32>
    %cst_97 = arith.constant dense<0.000000e+00> : vector<1xf32>
    %159 = vector.multi_reduction <add>, %158, %cst_97 [1, 2] : vector<1x16x1xf32> to vector<1xf32>
    %160 = vector.shape_cast %159 : vector<1xf32> to vector<1x1x1xf32>
    %161 = vector.extract %160[0, 0, 0] : f32 from vector<1x1x1xf32>
    %cst_98 = arith.constant 0.000000e+00 : f32
    %162 = arith.subf %cst_98, %161 : f32
    %163 = vector.extract_strided_slice %138 {offsets = [0, 48], sizes = [16, 24], strides = [1, 1]} : vector<16x72xf32> to vector<16x24xf32>
    %164 = arith.mulf %163, %163 : vector<16x24xf32>
    %cst_99 = arith.constant dense<0.000000e+00> : vector<16xf32>
    %165 = vector.multi_reduction <add>, %164, %cst_99 [1] : vector<16x24xf32> to vector<16xf32>
    %166 = vector.shape_cast %165 : vector<16xf32> to vector<16x1xf32>
    %167 = math.sqrt %166 : vector<16x1xf32>
    %168 = arith.mulf %163, %144 : vector<16x24xf32>
    %cst_100 = arith.constant dense<0.000000e+00> : vector<16xf32>
    %169 = vector.multi_reduction <add>, %168, %cst_100 [1] : vector<16x24xf32> to vector<16xf32>
    %170 = vector.shape_cast %169 : vector<16xf32> to vector<16x1xf32>
    %cst_101 = arith.constant 9.99999993E-9 : f32
    %171 = vector.broadcast %cst_101 : f32 to vector<16x1xf32>
    %172 = arith.maximumf %167, %171 : vector<16x1xf32>
    %cst_102 = arith.constant 9.99999993E-9 : f32
    %173 = vector.broadcast %cst_102 : f32 to vector<16x1xf32>
    %174 = arith.maximumf %148, %173 : vector<16x1xf32>
    %175 = arith.mulf %172, %174 : vector<16x1xf32>
    %176 = arith.divf %170, %175 : vector<16x1xf32>
    %177 = vector.shape_cast %176 : vector<16x1xf32> to vector<1x16x1xf32>
    %cst_103 = arith.constant dense<0.000000e+00> : vector<1xf32>
    %178 = vector.multi_reduction <add>, %177, %cst_103 [1, 2] : vector<1x16x1xf32> to vector<1xf32>
    %179 = vector.shape_cast %178 : vector<1xf32> to vector<1x1x1xf32>
    %180 = vector.extract %179[0, 0, 0] : f32 from vector<1x1x1xf32>
    %181 = arith.subf %162, %180 : f32
    %c0_104 = arith.constant 0 : index
    %c0_105 = arith.constant 0 : index
    %182 = memref.load %arg16[%c0_104, %c0_105] : memref<1x1xf32, #tpu.memory_space<smem>>
    memref.store %181, %arg16[%c0_104, %c0_105] : memref<1x1xf32, #tpu.memory_space<smem>>
    return
  }
}

</mosaic_0001>

<bundles_post_ra>
// kernel: net_forward.1
= control target key start
LH: loop header
LB: loop body
LE: loop exit
PB: predicated region body
PF: predicated region fallthrough
CT: control target
= control target key end

     0   :  { %s1697_s0 = inlined_call_operand.vmem [shape: f32[32,16], index: 0, kind: input, shape index: {}]   ;;  %s1698_s1 = inlined_call_operand.vmem [shape: f32[32,1], index: 1, kind: input, shape index: {}]   ;;  %s1699_s2 = inlined_call_operand.vmem [shape: bf16[3,16,16], index: 2, kind: input, shape index: {}]   ;;  %s1700_s3 = inlined_call_operand.vmem [shape: bf16[3,16,16], index: 3, kind: input, shape index: {}]   ;;  %s1701_s4 = inlined_call_operand.vmem [shape: f32[16,72], index: 4, kind: input, shape index: {}]   ;;  %s1702_s5 = inlined_call_operand.vmem [shape: f32[24,32], index: 5, kind: input, shape index: {}]   ;;  %s1703_s6 = inlined_call_operand.vmem [shape: f32[1,32], index: 6, kind: input, shape index: {}]   ;;  %s1704_s7 = inlined_call_operand.vmem [shape: f32[32,96], index: 7, kind: input, shape index: {}]   ;;  %s1705_s8 = inlined_call_operand.vmem [shape: f32[32,32], index: 8, kind: input, shape index: {}]   ;;  %s1706_s9 = inlined_call_operand.vmem [shape: f32[1,32], index: 9, kind: input, shape index: {}]   ;;  %s1707_s10 = inlined_call_operand.vmem [shape: f32[32,64], index: 10, kind: input, shape index: {}]   ;;  %s1708_s11 = inlined_call_operand.vmem [shape: f32[2,128], index: 11, kind: input, shape index: {}]   ;;  %s1709_s12 = inlined_call_operand.vmem [shape: s32[32], index: 12, kind: input, shape index: {}]   ;;  %s1710_s13 = inlined_call_operand.vmem [shape: s32[32], index: 13, kind: input, shape index: {}]   ;;  %s1711_s14 = inlined_call_operand.vmem [shape: f32[32,32], index: 14, kind: output, shape index: {0}]   ;;  %s1712_s15 = inlined_call_operand.vmem [shape: f32[32,128], index: 15, kind: output, shape index: {1}]   ;;  %s1713_s16 = inlined_call_operand.hbm [shape: f32[1,1], index: 16, kind: output, shape index: {2}]  }
   0x1   :  { %1715 = sst [smem:[#allocation13_spill]] %s1697_s0 }
   0x2   :  { %22 = vsyncpa [#allocation6], 0 }
   0x3   :  { %23 = vsyncpa [#allocation8], 0 }
   0x4   :  { %24 = vsyncpa [#allocation5], 0  ;;  %s54_s23 = sshll.u32 %s1709_s12, 4  ;;  %s63_s26 = sshll.u32 %s1710_s13, 4  ;;  %s55_s23 = int_to_ptr.vmem [resolvable:$true] %s54_s23  ;;  %s64_s26 = int_to_ptr.vmem [resolvable:$true] %s63_s26 }
   0x5   :  { %s1252_s27 = smov [#allocation4]   ;;  %s1253_s28 = smov [#allocation7]  }
   0x6   :  { %57 = dma.vmem_to_smem %s55_s23, 16, %s1252_s27, [#allocation6]  }
   0x7   :  { %66 = dma.vmem_to_smem %s64_s26, 16, %s1253_s28, [#allocation8]  }
   0x8   :  { %1242 = dma.done.wait [#allocation6], 16  }
   0x9   :  { %1243 = vsyncadd [#allocation6], 4294967280 }
   0xa   :  { %1244 = dma.done.wait [#allocation8], 16  }
   0xb   :  { %1245 = vsyncadd [#allocation8], 4294967280 }
   0xc   :  { %75 = sfence }
   0xd   :  { %v77_v0 = vld [vmem:[%s1698_s1] sm:$0xff]  ;;  %v79_v1 = vld [vmem:[%s1698_s1 + $0x10] sm:$0xff]  ;;  %v1254_v2 = vmov 0   ;;  %v110_v3 = vld [vmem:[%s1701_s4 + $0x8] sm:$0xff]  ;;  %s1716_s26 = sld [smem:[#allocation13_spill]]  ;;  %vm111_vm0 = vcmask 130048  }
   0xe   :  { %1178 = vset.pattern.permute.xlu0 %v1254_v2  ;;  %1179 = vset.pattern.permute.xlu1 %v1254_v2  ;;  %v78_v4 = vld [vmem:[%s1698_s1 + $0x8] sm:$0xff]  ;;  %v80_v5 = vld [vmem:[%s1698_s1 + $0x18] sm:$0xff]  ;;  %v109_v6 = vld [vmem:[%s1701_s4] sm:$0xff]  ;;  %s1255_s0 = smov 80   ;;  %s1256_s13 = smov 104   ;;  %vm356_vm2 = vcmask 195584  }
   0xf   :  { %87 = vperm.xlu0 %1178, %v77_v0   ;;  %97 = vperm.xlu1 %1179, %v79_v1   ;;  %v1406_v33 = vld [vmem:[%s1699_s2] sm:$0xff]  ;;  %v1413_v35 = vld [vmem:[%s1700_s3 + $0x8] sm:$0xff]  ;;  %v1420_v37 = vld [vmem:[%s1699_s2 + $0x10] sm:$0xff]  ;;  %vm406_vm6 = vcmask 261120   ;;  %s1248_s23 = smov 0  }
  0x10   :  { %138 = vmatpush.msra.mxu0 %v110_v3  ;;  %v1427_v39 = vld [vmem:[%s1700_s3 + $0x10] sm:$0xff]  ;;  %v1434_v41 = vld [vmem:[%s1699_s2 + $0x8] sm:$0xff]  ;;  %v1441_v42 = vld [vmem:[%s1700_s3] sm:$0xff] }
  0x11   :  { %v351_v43 = vld [vmem:[%s1702_s5 + $0x10] sm:$0xff]  ;;  %v350_v44 = vld [vmem:[%s1702_s5 + $0x8] sm:$0xff]  ;;  %v349_v45 = vld [vmem:[%s1702_s5] sm:$0xff] }
  0x12   :  { %139 = vmatpush.msra.mxu0 %v109_v6  ;;  %v405_v52 = vld [vmem:[%s1704_s7 + $0x18] sm:$0xff] }
  0x13   :  { %v81_v7 = vld [vmem:[%s1716_s26] sm:$0xff]  ;;  %v82_v10 = vld [vmem:[%s1716_s26 + $0x8] sm:$0xff]  ;;  %v83_v14 = vld [vmem:[%s1716_s26 + $0x10] sm:$0xff] }
  0x14   :  { %v84_v17 = vld [vmem:[%s1716_s26 + $0x18] sm:$0xff]  ;;  %382 = vmatpush.msrb.mxu0 %v351_v43 }
  0x16   :  { %383 = vmatpush.msrb.mxu0 %v350_v44 }
  0x17   :  { %92 = vperm.xlu0 %1178, %v78_v4   ;;  %102 = vperm.xlu1 %1179, %v80_v5  }
  0x18   :  { %384 = vmatpush.msrb.mxu0 %v349_v45 }
  0x81   :  { %v1374_v8 = vpop.permute.xlu0 %87  ;;  %v1385_v13 = vpop.permute.xlu1 %97 }
  0x82   :  { %v105_v9 = vmul.f32 %v1374_v8, %v81_v7  ;;  %v107_v15 = vmul.f32 %v1385_v13, %v83_v14 }
  0x84   :  { %1077 = vmatmul.msk.f32.vlgmr.msra.gmra.mxu0 %vm111_vm0, %v105_v9 }
  0x89   :  { %v1381_v11 = vpop.permute.xlu0 %92  ;;  %v1392_v16 = vpop.permute.xlu1 %102 }
  0x8a   :  { %v106_v12 = vmul.f32 %v1381_v11, %v82_v10  ;;  %v108_v18 = vmul.f32 %v1392_v16, %v84_v17 }
  0x8c   :  { %1078 = vmatmul.msk.f32.gmra.mxu0 %vm111_vm0, %v106_v12 }
  0x94   :  { %1079 = vmatmul.msk.f32.gmra.mxu0 %vm111_vm0, %v107_v15 }
  0x9c   :  { %1080 = vmatmul.msk.f32.gmra.mxu0 %vm111_vm0, %v108_v18 }
 0x101   :  { %v141_v19 = vpop.f32.mrf.mxu0 }
 0x102   :  { %v153_v20 = vpack.c.bf16 %v141_v19, %v141_v19  ;;  %v404_v19 = vld [vmem:[%s1704_s7 + $0x10] sm:$0xff] }
 0x104   :  { %v227_v23 = vunpack.c.l.b16 %v153_v20  ;;  %v403_v20 = vld [vmem:[%s1704_s7 + $0x8] sm:$0xff] }
 0x109   :  { %v144_v21 = vpop.f32.mrf.mxu0 }
 0x10a   :  { %v154_v22 = vpack.c.bf16 %v144_v21, %v144_v21  ;;  %v402_v21 = vld [vmem:[%s1704_s7] sm:$0xff]  ;;  %s1258_s7 = smov 64  }
 0x10c   :  { %v228_v24 = vunpack.c.l.b16 %v154_v22  ;;  %v1180_v22 = vld [vmem:[%s1703_s6] ss:$0 sm:$0xff]  ;;  %s1257_s6 = smov 96  }
 0x10e   :  { %v229_v25 = vpack.c.b16 %v228_v24, %v227_v23 }
 0x110   :  { %311 = vrot.lane.b32.xlu1 %v229_v25, %s1255_s0  ;;  %230 = vrot.lane.b32.xlu2 %v229_v25, %s1256_s13 }
 0x111   :  { %v147_v26 = vpop.f32.mrf.mxu0 }
 0x112   :  { %v155_v27 = vpack.c.bf16 %v147_v26, %v147_v26 }
 0x114   :  { %v171_v30 = vunpack.c.l.b16 %v155_v27 }
 0x119   :  { %v150_v28 = vpop.f32.mrf.mxu0 }
 0x11a   :  { %v156_v29 = vpack.c.bf16 %v150_v28, %v150_v28 }
 0x11c   :  { %v172_v31 = vunpack.c.l.b16 %v156_v29 }
 0x11e   :  { %v173_v32 = vpack.c.b16 %v172_v31, %v171_v30 }
 0x120   :  { %174 = vrot.lane.b32.xlu0 %v173_v32, %s1256_s13  ;;  %281 = vrot.lane.b32.xlu2 %v173_v32, %s1255_s0 }
 0x121   :  { %210 = vmatpush.bf16.msra.mxu2 %v173_v32 }
 0x124   :  { %1092 = vmatmul.msk.bf16.vlgmr.msra.gmra.mxu2 %vm111_vm0, %v1406_v33 }
 0x16a   :  { %v231_v34 = vpop.permute.xlu2 %230 }
 0x16b   :  { %243 = vmatpush.bf16.msra.mxu3 %v231_v34 }
 0x16e   :  { %1099 = vmatmul.msk.bf16.vlgmr.msra.gmra.mxu3 %vm111_vm0, %v1413_v35 }
 0x17a   :  { %v282_v36 = vpop.permute.xlu2 %281 }
 0x17b   :  { %294 = vmatpush.bf16.msrb.mxu2 %v282_v36 }
 0x17e   :  { %1111 = vmatmul.msk.bf16.vlgmr.msrb.gmra.mxu2 %vm111_vm0, %v1420_v37 }
 0x182   :  { %v312_v38 = vpop.permute.xlu1 %311 }
 0x183   :  { %324 = vmatpush.bf16.msrb.mxu3 %v312_v38 }
 0x186   :  { %1118 = vmatmul.msk.bf16.vlgmr.msrb.gmra.mxu3 %vm111_vm0, %v1427_v39 }
 0x192   :  { %v175_v40 = vpop.permute.xlu0 %174 }
 0x193   :  { %187 = vmatpush.bf16.msra.mxu1 %v175_v40 }
 0x196   :  { %1087 = vmatmul.msk.bf16.vlgmr.msra.gmra.mxu1 %vm111_vm0, %v1434_v41 }
 0x197   :  { %266 = vmatpush.bf16.msrb.mxu1 %v229_v25 }
 0x19b   :  { %431 = vmatpush.msra.mxu1 %v405_v52 }
 0x19d   :  { %432 = vmatpush.msra.mxu1 %v404_v19 }
 0x19f   :  { %433 = vmatpush.msra.mxu1 %v403_v20 }
 0x1a1   :  { %434 = vmatpush.msra.mxu1 %v402_v21 }
 0x1a6   :  { %1104 = vmatmul.msk.bf16.vlgmr.msrb.gmra.mxu1 %vm111_vm0, %v1441_v42 }
 0x1a7   :  { %v212_v46 = vpop.f32.mrf.mxu2 }
 0x1af   :  { %v214_v47 = vpop.f32.mrf.mxu2 }
 0x1f1   :  { %v245_v48 = vpop.f32.mrf.mxu3 }
 0x1f9   :  { %v247_v55 = vpop.f32.mrf.mxu3 }
 0x201   :  { %v296_v49 = vpop.f32.mrf.mxu2 }
 0x209   :  { %v298_v60 = vpop.f32.mrf.mxu2  ;;  %v326_v0 = vpop.f32.mrf.mxu3 }
 0x211   :  { %v328_v12 = vpop.f32.mrf.mxu3 }
 0x213   :  { %v189_v50 = vpop.f32.mrf.mxu1 }
 0x214   :  { %v213_v51 = vadd.f32 %v212_v46, %v189_v50 }
 0x216   :  { %v301_v53 = vadd.f32 %v296_v49, %v213_v51 }
 0x218   :  { %v333_v54 = vmul.f32 %v301_v53, %v1374_v8 }
 0x21a   :  { %vm337_vm1 = vcmp.gt.f32.partialorder %v333_v54, 0.0  ;;  %v341_v56 = vmul.f32 0.1, %v333_v54 }
 0x21b   :  { %v191_v57 = vpop.f32.mrf.mxu1 }
 0x21c   :  { %v215_v58 = vadd.f32 %v214_v47, %v191_v57  ;;  %v345_v59 = vsel %vm337_vm1, %v333_v54, %v341_v56 }
 0x21d   :  { %1119 = vmatmul.msk.f32.vlgmr.msrb.gmra.mxu0 %vm356_vm2, %v345_v59 }
 0x21e   :  { %v302_v61 = vadd.f32 %v298_v60, %v215_v58 }
 0x220   :  { %v334_v62 = vmul.f32 %v302_v61, %v1381_v11 }
 0x222   :  { %vm338_vm3 = vcmp.gt.f32.partialorder %v334_v62, 0.0  ;;  %v342_v63 = vmul.f32 0.1, %v334_v62 }
 0x223   :  { %v268_v1 = vpop.f32.mrf.mxu1 }
 0x224   :  { %v269_v2 = vadd.f32 %v268_v1, %v245_v48  ;;  %v346_v3 = vsel %vm338_vm3, %v334_v62, %v342_v63 }
 0x225   :  { %1120 = vmatmul.msk.f32.gmra.mxu0 %vm356_vm2, %v346_v3 }
 0x226   :  { %v331_v4 = vadd.f32 %v326_v0, %v269_v2 }
 0x228   :  { %v335_v5 = vmul.f32 %v331_v4, %v1385_v13 }
 0x22a   :  { %vm339_vm4 = vcmp.gt.f32.partialorder %v335_v5, 0.0  ;;  %v343_v6 = vmul.f32 0.1, %v335_v5 }
 0x22b   :  { %v270_v7 = vpop.f32.mrf.mxu1 }
 0x22c   :  { %v271_v9 = vadd.f32 %v270_v7, %v247_v55  ;;  %v347_v10 = vsel %vm339_vm4, %v335_v5, %v343_v6 }
 0x22d   :  { %1121 = vmatmul.msk.f32.gmra.mxu0 %vm356_vm2, %v347_v10 }
 0x22e   :  { %v332_v14 = vadd.f32 %v328_v12, %v271_v9 }
 0x230   :  { %v336_v15 = vmul.f32 %v332_v14, %v1392_v16 }
 0x232   :  { %vm340_vm5 = vcmp.gt.f32.partialorder %v336_v15, 0.0  ;;  %v344_v17 = vmul.f32 0.1, %v336_v15 }
 0x234   :  { %v348_v18 = vsel %vm340_vm5, %v336_v15, %v344_v17 }
 0x235   :  { %1122 = vmatmul.msk.f32.gmra.mxu0 %vm356_vm2, %v348_v18 }
 0x29a   :  { %v386_v23 = vpop.f32.mrf.mxu0 }
 0x29b   :  { %v1477_v24 = vadd.f32 %v1180_v22, %v386_v23 }
 0x29d   :  { %v398_v25 = vmul.f32 %v1477_v24, %v1374_v8 }
 0x29f   :  { %1123 = vmatmul.msk.f32.vlgmr.msra.gmra.mxu1 %vm406_vm6, %v398_v25 }
 0x2a2   :  { %v389_v26 = vpop.f32.mrf.mxu0 }
 0x2a3   :  { %v1482_v27 = vadd.f32 %v1180_v22, %v389_v26 }
 0x2a5   :  { %v399_v28 = vmul.f32 %v1482_v27, %v1381_v11 }
 0x2a7   :  { %1124 = vmatmul.msk.f32.gmra.mxu1 %vm406_vm6, %v399_v28 }
 0x2aa   :  { %v392_v29 = vpop.f32.mrf.mxu0 }
 0x2ab   :  { %v1487_v30 = vadd.f32 %v1180_v22, %v392_v29 }
 0x2ad   :  { %v400_v31 = vmul.f32 %v1487_v30, %v1385_v13 }
 0x2af   :  { %1125 = vmatmul.msk.f32.gmra.mxu1 %vm406_vm6, %v400_v31 }
 0x2b2   :  { %v395_v32 = vpop.f32.mrf.mxu0 }
 0x2b3   :  { %v1492_v34 = vadd.f32 %v1180_v22, %v395_v32 }
 0x2b5   :  { %v401_v36 = vmul.f32 %v1492_v34, %v1392_v16 }
 0x2b7   :  { %1126 = vmatmul.msk.f32.gmra.mxu1 %vm406_vm6, %v401_v36 }
 0x31c   :  { %v436_v38 = vpop.f32.mrf.mxu1 }
 0x31d   :  { %v448_v40 = vpack.c.bf16 %v436_v38, %v436_v38 }
 0x31f   :  { %v491_v45 = vunpack.c.l.b16 %v448_v40 }
 0x324   :  { %v439_v43 = vpop.f32.mrf.mxu1 }
 0x325   :  { %v449_v44 = vpack.c.bf16 %v439_v43, %v439_v43 }
 0x327   :  { %v492_v46 = vunpack.c.l.b16 %v449_v44 }
 0x329   :  { %v493_v47 = vpack.c.b16 %v492_v46, %v491_v45 }
 0x32b   :  { %494 = vrot.lane.b32.xlu1 %v493_v47, %s1257_s6 }
 0x32c   :  { %v442_v48 = vpop.f32.mrf.mxu1 }
 0x32d   :  { %v450_v49 = vpack.c.bf16 %v442_v48, %v442_v48 }
 0x32f   :  { %v454_v52 = vunpack.c.l.b16 %v450_v49 }
 0x334   :  { %v445_v50 = vpop.f32.mrf.mxu1 }
 0x335   :  { %v451_v51 = vpack.c.bf16 %v445_v50, %v445_v50 }
 0x337   :  { %v455_v53 = vunpack.c.l.b16 %v451_v51 }
 0x339   :  { %v456_v54 = vpack.c.b16 %v455_v53, %v454_v52 }
 0x33b   :  { %526 = vrot.lane.b32.xlu0 %v456_v54, %s1258_s7  ;;  %457 = vrot.lane.b32.xlu2 %v456_v54, %s1257_s6 }
 0x33c   :  { %482 = vmatpush.bf16.msra.mxu3 %v456_v54 }
 0x33f   :  { %1128 = vmatmul.msk.bf16.vlgmr.msra.gmra.mxu3 %vm111_vm0, %v1406_v33 }
 0x340   :  { %519 = vmatpush.bf16.msrb.mxu3 %v493_v47 }
 0x343   :  { %545 = vrot.lane.b32.xlu2 %v493_v47, %s1258_s7 }
 0x34f   :  { %1130 = vmatmul.msk.bf16.vlgmr.msrb.gmra.mxu3 %vm111_vm0, %v1441_v42  ;;  %v583_v42 = vld [vmem:[%s1705_s8 + $0x18] sm:$0xff] }
 0x395   :  { %v458_v55 = vpop.permute.xlu2 %457 }
 0x396   :  { %467 = vmatpush.bf16.msra.mxu2 %v458_v55 }
 0x399   :  { %1127 = vmatmul.msk.bf16.vlgmr.msra.gmra.mxu2 %vm111_vm0, %v1434_v41  ;;  %v582_v41 = vld [vmem:[%s1705_s8 + $0x10] sm:$0xff] }
 0x39d   :  { %v495_v56 = vpop.permute.xlu1 %494  ;;  %v546_v57 = vpop.permute.xlu2 %545 }
 0x39e   :  { %504 = vmatpush.bf16.msrb.mxu2 %v495_v56  ;;  %555 = vmatpush.bf16.msrb.mxu1 %v546_v57 }
 0x3a1   :  { %1132 = vmatmul.msk.bf16.vlgmr.msrb.gmra.mxu1 %vm111_vm0, %v1427_v39 }
 0x3a2   :  { %1148 = vmatpush.msra.mxu2 %v583_v42 }
 0x3a4   :  { %1149 = vmatpush.msra.mxu2 %v582_v41 }
 0x3a9   :  { %1129 = vmatmul.msk.bf16.vlgmr.msrb.gmra.mxu2 %vm111_vm0, %v1413_v35  ;;  %v581_v35 = vld [vmem:[%s1705_s8 + $0x8] sm:$0xff] }
 0x3aa   :  { %1150 = vmatpush.msra.mxu2 %v581_v35 }
 0x3ad   :  { %v527_v33 = vpop.permute.xlu0 %526 }
 0x3ae   :  { %536 = vmatpush.bf16.msra.mxu0 %v527_v33 }
 0x3b1   :  { %1131 = vmatmul.msk.bf16.vlgmr.msra.gmra.mxu0 %vm111_vm0, %v1420_v37  ;;  %v580_v37 = vld [vmem:[%s1705_s8] sm:$0xff] }
 0x3b2   :  { %612 = vmatpush.msrb.mxu0 %v583_v42  ;;  %1151 = vmatpush.msra.mxu2 %v580_v37 }
 0x3b4   :  { %613 = vmatpush.msrb.mxu0 %v582_v41 }
 0x3b6   :  { %614 = vmatpush.msrb.mxu0 %v581_v35 }
 0x3b8   :  { %615 = vmatpush.msrb.mxu0 %v580_v37 }
 0x3c2   :  { %v484_v58 = vpop.f32.mrf.mxu3 }
 0x3ca   :  { %v486_v60 = vpop.f32.mrf.mxu3 }
 0x3d2   :  { %v521_v1 = vpop.f32.mrf.mxu3 }
 0x3da   :  { %v523_v17 = vpop.f32.mrf.mxu3 }
 0x41c   :  { %v469_v39 = vpop.f32.mrf.mxu2 }
 0x41d   :  { %v485_v61 = vadd.f32 %v484_v58, %v469_v39 }
 0x41e   :  { %v557_v4 = vpop.f32.mrf.mxu1 }
 0x424   :  { %v471_v59 = vpop.f32.mrf.mxu2 }
 0x425   :  { %v487_v5 = vadd.f32 %v486_v60, %v471_v59 }
 0x426   :  { %v559_v21 = vpop.f32.mrf.mxu1 }
 0x42c   :  { %v506_v0 = vpop.f32.mrf.mxu2 }
 0x42d   :  { %v522_v6 = vadd.f32 %v521_v1, %v506_v0 }
 0x42e   :  { %v538_v62 = vpop.f32.mrf.mxu0 }
 0x42f   :  { %v543_v63 = vadd.f32 %v538_v62, %v485_v61  ;;  %v562_v12 = vadd.f32 %v557_v4, %v522_v6 }
 0x431   :  { %v564_v2 = vmul.f32 %v543_v63, %v1374_v8  ;;  %v566_v19 = vmul.f32 %v562_v12, %v1385_v13  ;;  %v1181_v13 = vld [vmem:[%s1706_s9] ss:$0 sm:$0xff] }
 0x433   :  { %vm568_vm7 = vcmp.gt.f32.partialorder %v564_v2, 0.0  ;;  %v572_v3 = vmul.f32 0.1, %v564_v2  ;;  %v574_v23 = vmul.f32 0.1, %v566_v19  ;;  %vm570_vm9 = vcmp.gt.f32.partialorder %v566_v19, 0.0 }
 0x434   :  { %v508_v15 = vpop.f32.mrf.mxu2 }
 0x435   :  { %v576_v7 = vsel %vm568_vm7, %v564_v2, %v572_v3  ;;  %v524_v8 = vadd.f32 %v523_v17, %v508_v15  ;;  %v578_v26 = vsel %vm570_vm9, %v566_v19, %v574_v23 }
 0x436   :  { %v540_v9 = vpop.f32.mrf.mxu0  ;;  %1133 = vmatmul.msk.f32.vlgmr.msrb.gmra.mxu0 %vm406_vm6, %v576_v7 }
 0x437   :  { %v544_v10 = vadd.f32 %v540_v9, %v487_v5  ;;  %v563_v22 = vadd.f32 %v559_v21, %v524_v8 }
 0x439   :  { %v565_v14 = vmul.f32 %v544_v10, %v1381_v11  ;;  %v567_v25 = vmul.f32 %v563_v22, %v1392_v16 }
 0x43b   :  { %vm569_vm8 = vcmp.gt.f32.partialorder %v565_v14, 0.0  ;;  %v573_v18 = vmul.f32 0.1, %v565_v14  ;;  %v575_v11 = vmul.f32 0.1, %v567_v25  ;;  %vm571_vm10 = vcmp.gt.f32.partialorder %v567_v25, 0.0 }
 0x43d   :  { %v577_v20 = vsel %vm569_vm8, %v565_v14, %v573_v18  ;;  %v579_v28 = vsel %vm571_vm10, %v567_v25, %v575_v11 }
 0x43e   :  { %1134 = vmatmul.msk.f32.vlgmr.msra.gmra.mxu2 %vm406_vm6, %v577_v20 }
 0x446   :  { %1135 = vmatmul.msk.f32.gmra.mxu2 %vm406_vm6, %v578_v26 }
 0x44e   :  { %1136 = vmatmul.msk.f32.gmra.mxu2 %vm406_vm6, %v579_v28 }
 0x4b3   :  { %v617_v29 = vpop.f32.mrf.mxu0 }
 0x4b4   :  { %v618_v31 = vadd.f32 %v1181_v13, %v617_v29 }
 0x4b6   :  { %v629_v32 = vmul.f32 0.5, %v618_v31 }
 0x4b8   :  { %v633_v36 = vadd.f32 %v629_v32, %v1477_v24 }
 0x4ba   :  { %637 = vst.msk [vmem:[%s1711_s14] sm:$0xff] %vm406_vm6, %v633_v36 }
 0x4c1   :  { %v620_v16 = vpop.f32.mrf.mxu2 }
 0x4c2   :  { %v621_v38 = vadd.f32 %v1181_v13, %v620_v16 }
 0x4c4   :  { %v630_v40 = vmul.f32 0.5, %v621_v38 }
 0x4c6   :  { %v634_v43 = vadd.f32 %v630_v40, %v1482_v27 }
 0x4c8   :  { %638 = vst.msk [vmem:[%s1711_s14 + $0x8] sm:$0xff] %vm406_vm6, %v634_v43 }
 0x4c9   :  { %v623_v44 = vpop.f32.mrf.mxu2 }
 0x4ca   :  { %v624_v45 = vadd.f32 %v1181_v13, %v623_v44 }
 0x4cc   :  { %v631_v46 = vmul.f32 0.5, %v624_v45 }
 0x4ce   :  { %v635_v24 = vadd.f32 %v631_v46, %v1487_v30 }
 0x4d0   :  { %639 = vst.msk [vmem:[%s1711_s14 + $0x10] sm:$0xff] %vm406_vm6, %v635_v24 }
 0x4d1   :  { %v626_v47 = vpop.f32.mrf.mxu2 }
 0x4d2   :  { %v627_v48 = vadd.f32 %v1181_v13, %v626_v47 }
 0x4d4   :  { %v632_v49 = vmul.f32 0.5, %v627_v48 }
 0x4d6   :  { %v636_v27 = vadd.f32 %v632_v49, %v1492_v34 }
 0x4d8   :  { %640 = vst.msk [vmem:[%s1711_s14 + $0x18] sm:$0xff] %vm406_vm6, %v636_v27 }
 0x4d9 LB: > { %s647_s24 = sld [smem:[#allocation4 + %s1250_s23]]  ;;  %vm652_vm11 = vcmask 253952   ;;  %s651_s30 = scalar_lea.vmem [#allocation2], %s1250_s23  ;;  %s1250_s23 = sphi %s1248_s23, %s646_s23  }
 0x4da   : > { %s648_s25 = sld [smem:[#allocation7 + %s1250_s23]]  ;;  %s657_s2 = scalar_lea.vmem [#allocation3], %s1250_s23 }
 0x4db   : > { %s646_s23 = sadd.s32 1, %s1250_s23  }
 0x4dc   : > { %p643_p0 = scmp.ge.s32.totalorder %s646_s23, 32  }
 0x4dd   :  { %v799_v50 = vld [vmem:[%s1701_s4] sm:$0xff] (%p643_p0)  ;;  %s1259_s17 = smov (%p643_p0), 24   ;;  %v800_v52 = vld [vmem:[%s1701_s4 + $0x8] sm:$0xff] (%p643_p0)  ;;  %v671_v60 = vld [vmem:[%s1707_s10 + $0x18] sm:$0xff] (%p643_p0)  ;;  %s1260_s20 = smov (%p643_p0), 32  }
 0x4de   :  { %645 = sbr.rel (!%p643_p0) target bundleno = 1241 (0x4d9), region = 116  ;;  %873 = vrot.lane.b32.xlu1 (%p643_p0), %v799_v50, %s1259_s17  ;;  %v801_v51 = vmul.f32 (%p643_p0), %v799_v50, %v799_v50  ;;  %v802_v53 = vmul.f32 (%p643_p0), %v800_v52, %v800_v52  ;;  %v670_v61 = vld [vmem:[%s1707_s10 + $0x10] sm:$0xff] (%p643_p0)  ;;  %696 = vmatpush.msra.mxu1 (%p643_p0), %v671_v60  ;;  %v669_v0 = vld [vmem:[%s1707_s10 + $0x8] sm:$0xff] (%p643_p0)  ;;  %v668_v1 = vld [vmem:[%s1707_s10] sm:$0xff] (%p643_p0)  ;;  %s1051_s7 = sshll.u32 (%p643_p0), %s1713_s16, 4  ;;  %s1052_s7 = int_to_ptr.hbm [resolvable:$true] %s1051_s7 }
 0x4df   : > { %s649_s27 = scalar_lea.vmem %s1711_s14, %s647_s24  ;;  %1152 = vmatpush.msra.mxu3 (%p643_p0), %v671_v60  ;;  %s1261_s28 = smov (%p643_p0), [#allocation9]  }
 0x4e0   : > { %v650_v30 = vld [vmem:[%s649_s27] sm:$0x1]  ;;  %s1069_s29 = scalar_lea.vmem %s1711_s14, %s648_s25  ;;  %835 = vrot.lane.b32.xlu0 (%p643_p0), %v801_v51, %s1256_s13  ;;  %945 = vrot.lane.b32.xlu2 (%p643_p0), %v801_v51, %s1255_s0  ;;  %v806_v54 = vsel (%p643_p0), %vm356_vm2, %v802_v53, 0.0  ;;  %v803_v55 = vsel (%p643_p0), %vm356_vm2, %v801_v51, 0.0 }
 0x4e1   : > { %653 = vst.msk [vmem:[%s651_s30] sm:$0x1] %vm652_vm11, %v650_v30  ;;  %v1137_v34 = vld [vmem:[%s1069_s29 + $0x10] sm:$0x1]  ;;  %697 = vmatpush.msra.mxu1 (%p643_p0), %v670_v61  ;;  %1153 = vmatpush.msra.mxu3 (%p643_p0), %v670_v61 }
 0x4e2   : > { %658 = vst.msk [vmem:[%s657_s2] sm:$0x1] %vm652_vm11, %v1137_v34 }
 0x4e3   :  { %698 = vmatpush.msra.mxu1 %v669_v0  ;;  %1154 = vmatpush.msra.mxu3 %v669_v0 }
 0x4e5   :  { %699 = vmatpush.msra.mxu1 %v668_v1  ;;  %1155 = vmatpush.msra.mxu3 %v668_v1 }
 0x4e6   :  { %875 = vrot.lane.b32.xlu1 %v800_v52, %s1259_s17 }
 0x4e8   :  { %837 = vrot.lane.b32.xlu0 %v802_v53, %s1256_s13  ;;  %947 = vrot.lane.b32.xlu2 %v802_v53, %s1255_s0  ;;  %v659_v3 = vld [vmem:[#allocation2] sm:$0xff]  ;;  %v660_v7 = vld [vmem:[#allocation2 + $0x8] sm:$0xff]  ;;  %v661_v31 = vld [vmem:[#allocation2 + $0x10] sm:$0xff] }
 0x4e9   :  { %v1584_v62 = vld [vmem:[#allocation3] sm:$0xff]  ;;  %1138 = vmatmul.msk.f32.vlgmr.msra.gmra.mxu1 %vm406_vm6, %v659_v3  ;;  %1139 = vmatmul.msk.f32.vlgmr.msra.gmra.mxu3 %vm406_vm6, %v660_v7  ;;  %v662_v48 = vld [vmem:[#allocation2 + $0x18] sm:$0xff] }
 0x4f1   :  { %1140 = vmatmul.msk.f32.gmra.mxu3 %vm406_vm6, %v661_v31 }
 0x4f9   :  { %1141 = vmatmul.msk.f32.gmra.mxu3 %vm406_vm6, %v662_v48 }
 0x510   :  { %807 = vadd.xlane.f32.xlu1 %v806_v54 }
 0x512   :  { %804 = vadd.xlane.f32.xlu0 %v803_v55  ;;  %v1611_v55 = vld [vmem:[#allocation3 + $0x18] sm:$0xff] }
 0x53a   :  { %v946_v58 = vpop.permute.xlu2 %945 }
 0x53b   :  { %v951_v59 = vsel %vm356_vm2, %v946_v58, 0.0 }
 0x542   :  { %v948_v63 = vpop.permute.xlu2 %947 }
 0x543   :  { %v954_v2 = vsel %vm356_vm2, %v948_v63, 0.0 }
 0x550   :  { %v874_v56 = vpop.permute.xlu1 %873 }
 0x551   :  { %v879_v57 = vmul.f32 %v874_v56, %v799_v50 }
 0x552   :  { %v836_v33 = vpop.permute.xlu0 %835 }
 0x553   :  { %883 = vrot.lane.b32.xlu0 %v879_v57, %s1256_s13  ;;  %v841_v42 = vsel %vm356_vm2, %v836_v33, 0.0  ;;  %v1615_v33 = vld [vmem:[#allocation3 + $0x10] sm:$0xff] }
 0x554   :  { %842 = vadd.xlane.f32.xlu2 %v841_v42 }
 0x558   :  { %v876_v41 = vpop.permute.xlu1 %875 }
 0x559   :  { %v880_v35 = vmul.f32 %v876_v41, %v800_v52 }
 0x55a   :  { %v838_v37 = vpop.permute.xlu0 %837 }
 0x55b   :  { %885 = vrot.lane.b32.xlu1 %v880_v35, %s1256_s13  ;;  %981 = vrot.lane.b32.xlu0 %v879_v57, %s1255_s0  ;;  %v844_v39 = vsel %vm356_vm2, %v838_v37, 0.0 }
 0x55c   :  { %845 = vadd.xlane.f32.xlu2 %v844_v39 }
 0x563   :  { %742 = vrot.lane.b32.xlu0 %v1584_v62, %s1260_s20 }
 0x564   :  { %952 = vadd.xlane.f32.xlu2 %v951_v59 }
 0x566   :  { %v1620_v0 = vpop.f32.mrf.mxu1 }
 0x56c   :  { %955 = vadd.xlane.f32.xlu2 %v954_v2 }
 0x583   :  { %v1597_v10 = vpop.xlane.xlu1 %807 }
 0x584   :  { %983 = vrot.lane.b32.xlu2 %v880_v35, %s1255_s0  ;;  %vm828_vm7 = vcmp.eq.f32.partialorder %v1597_v10, inf  ;;  %vm830_vm8 = vcmp.eq.f32.partialorder %v1597_v10, 0.0 }
 0x585   :  { %v805_v4 = vpop.xlane.xlu0 %804 }
 0x586   :  { %1182 = vrsqrt.f32 %v805_v4  ;;  %vm816_vm12 = vcmp.eq.f32.partialorder %v805_v4, inf  ;;  %v819_v36 = vand.u32 2147483648, %v805_v4  ;;  %vm818_vm13 = vcmp.eq.f32.partialorder %v805_v4, 0.0 }
 0x58c   :  { %v1183_v5 = vpop.eup %1182 }
 0x58d   :  { %v810_v6 = vmul.f32 %v1183_v5, %v805_v4 }
 0x58f   :  { %v811_v9 = vmul.f32 %v1183_v5, %v810_v6 }
 0x591   :  { %v812_v15 = vmul.f32 0.5, %v811_v9 }
 0x593   :  { %v813_v18 = vsub.f32 1.5, %v812_v15 }
 0x595   :  { %v814_v23 = vmul.f32 %v1183_v5, %v813_v18 }
 0x597   :  { %v815_v28 = vmul.f32 %v814_v23, %v805_v4 }
 0x599   :  { %v817_v16 = vsel %vm816_vm12, %v805_v4, %v815_v28  ;;  %v1634_v28 = vld [vmem:[#allocation3 + $0x8] sm:$0xff] }
 0x59a   :  { %v820_v45 = vsel %vm818_vm13, %v819_v36, %v817_v16  ;;  %v831_v16 = vand.u32 2147483648, %v1597_v10 }
 0x59b   :  { %v897_v27 = vmax.f32 %v820_v45, 1e-08 }
 0x5c5   :  { %v884_v12 = vpop.permute.xlu0 %883 }
 0x5c6   :  { %v889_v14 = vsel %vm356_vm2, %v884_v12, 0.0 }
 0x5c7   :  { %v843_v17 = vpop.xlane.xlu2 %842  ;;  %890 = vadd.xlane.f32.xlu1 %v889_v14 }
 0x5c8   :  { %1184 = vrsqrt.f32 %v843_v17  ;;  %vm854_vm14 = vcmp.eq.f32.partialorder %v843_v17, inf  ;;  %v857_v46 = vand.u32 2147483648, %v843_v17  ;;  %vm856_vm15 = vcmp.eq.f32.partialorder %v843_v17, 0.0 }
 0x5cd   :  { %v886_v19 = vpop.permute.xlu1 %885  ;;  %v982_v8 = vpop.permute.xlu0 %981 }
 0x5ce   :  { %v1185_v20 = vpop.eup %1184  ;;  %v987_v21 = vsel %vm356_vm2, %v982_v8, 0.0  ;;  %v892_v22 = vsel %vm356_vm2, %v886_v19, 0.0 }
 0x5cf   :  { %v848_v25 = vmul.f32 %v1185_v20, %v843_v17  ;;  %v1603_v26 = vpop.xlane.xlu2 %845  ;;  %988 = vadd.xlane.f32.xlu2 %v987_v21  ;;  %893 = vadd.xlane.f32.xlu0 %v892_v22 }
 0x5d0   :  { %1186 = vrsqrt.f32 %v1603_v26  ;;  %vm868_vm3 = vcmp.eq.f32.partialorder %v1603_v26, 0.0 }
 0x5d1   :  { %v849_v11 = vmul.f32 %v1185_v20, %v848_v25 }
 0x5d3   :  { %v850_v13 = vmul.f32 0.5, %v849_v11 }
 0x5d5   :  { %v851_v29 = vsub.f32 1.5, %v850_v13  ;;  %v743_v60 = vpop.permute.xlu0 %742 }
 0x5d6   :  { %v1187_v32 = vpop.eup %1186  ;;  %v754_v5 = vmul.f32 %v743_v60, %v1620_v0 }
 0x5d7   :  { %v852_v38 = vmul.f32 %v1185_v20, %v851_v29  ;;  %v860_v40 = vmul.f32 %v1187_v32, %v1603_v26  ;;  %v953_v43 = vpop.xlane.xlu2 %952 }
 0x5d8   :  { %1188 = vrsqrt.f32 %v953_v43  ;;  %vm964_vm0 = vcmp.eq.f32.partialorder %v953_v43, inf  ;;  %vm966_vm1 = vcmp.eq.f32.partialorder %v953_v43, 0.0  ;;  %v967_v1 = vand.u32 2147483648, %v953_v43 }
 0x5d9   :  { %v853_v44 = vmul.f32 %v852_v38, %v843_v17  ;;  %v861_v47 = vmul.f32 %v1187_v32, %v860_v40 }
 0x5db   :  { %v855_v24 = vsel %vm854_vm14, %v843_v17, %v853_v44  ;;  %v862_v50 = vmul.f32 0.5, %v861_v47  ;;  %v869_v17 = vand.u32 2147483648, %v1603_v26 }
 0x5dc   :  { %v858_v49 = vsel %vm856_vm15, %v857_v46, %v855_v24 }
 0x5dd   :  { %v895_v30 = vmax.f32 %v858_v49, 1e-08  ;;  %v863_v56 = vsub.f32 1.5, %v862_v50 }
 0x5de   :  { %v1189_v34 = vpop.eup %1188 }
 0x5df   :  { %v958_v51 = vmul.f32 %v1189_v34, %v953_v43  ;;  %v956_v52 = vpop.xlane.xlu2 %955  ;;  %v1609_v53 = vmul.f32 %v897_v27, %v895_v30  ;;  %v864_v35 = vmul.f32 %v1187_v32, %v863_v56 }
 0x5e0   :  { %1190 = vrsqrt.f32 %v956_v52  ;;  %vm976_vm4 = vcmp.eq.f32.partialorder %v956_v52, inf  ;;  %v979_v8 = vand.u32 2147483648, %v956_v52  ;;  %vm978_vm5 = vcmp.eq.f32.partialorder %v956_v52, 0.0 }
 0x5e1   :  { %v959_v54 = vmul.f32 %v1189_v34, %v958_v51  ;;  %v865_v2 = vmul.f32 %v864_v35, %v1603_v26  ;;  %1192 = vrsqrt.f32 %v1597_v10  ;;  %v912_v50 = vand.u32 2147483648, %v1609_v53 }
 0x5e2   :  { %1194 = vrcp.f32 %v1609_v53  ;;  %vm906_vm10 = vweird.f32 %v1609_v53 }
 0x5e3   :  { %v960_v57 = vmul.f32 0.5, %v959_v54  ;;  %748 = vrot.lane.b32.xlu0 %v1611_v55, %s1260_s20 }
 0x5e5   :  { %v961_v42 = vsub.f32 1.5, %v960_v57  ;;  %v913_v57 = vor.u32 1.1754944e-38, %v912_v50 }
 0x5e6   :  { %v1191_v41 = vpop.eup %1190 }
 0x5e7   :  { %v962_v37 = vmul.f32 %v1189_v34, %v961_v42  ;;  %v970_v39 = vmul.f32 %v1191_v41, %v956_v52  ;;  %v984_v58 = vpop.permute.xlu2 %983  ;;  %746 = vrot.lane.b32.xlu2 %v1615_v33, %s1260_s20  ;;  %v1193_v11 = vpop.eup %1192 }
 0x5e8   :  { %v990_v59 = vsel %vm356_vm2, %v984_v58, 0.0  ;;  %vm866_vm2 = vcmp.eq.f32.partialorder %v1603_v26, inf  ;;  %v822_v13 = vmul.f32 %v1193_v11, %v1597_v10  ;;  %v1195_v45 = vpop.eup %1194 }
 0x5e9   :  { %v963_v61 = vmul.f32 %v962_v37, %v953_v43  ;;  %v971_v63 = vmul.f32 %v1191_v41, %v970_v39  ;;  %991 = vadd.xlane.f32.xlu1 %v990_v59  ;;  %v867_v12 = vsel %vm866_vm2, %v1603_v26, %v865_v2  ;;  %v902_v24 = vmul.f32 %v1195_v45, %v1609_v53 }
 0x5ea   :  { %v870_v19 = vsel %vm868_vm3, %v869_v17, %v867_v12  ;;  %v823_v26 = vmul.f32 %v1193_v11, %v822_v13  ;;  %vm907_vm9 = vweird.f32 %v1195_v45  ;;  %v704_v17 = vpop.f32.mrf.mxu3 }
 0x5eb   :  { %v965_v3 = vsel %vm964_vm0, %v953_v43, %v963_v61  ;;  %v972_v4 = vmul.f32 0.5, %v971_v63  ;;  %v896_v22 = vmax.f32 %v870_v19, 1e-08  ;;  %v903_v48 = vsub.f32 1.0, %v902_v24  ;;  %vm908_vm12 = vmor %vm906_vm10, %vm907_vm9 }
 0x5ec   :  { %v968_v6 = vsel %vm966_vm1, %v967_v1, %v965_v3  ;;  %v824_v29 = vmul.f32 0.5, %v823_v26  ;;  %vm931_vm1 = vcmask 7168  }
 0x5ed   :  { %v993_v7 = vmax.f32 %v968_v6, 1e-08  ;;  %v973_v9 = vsub.f32 1.5, %v972_v4  ;;  %v904_v27 = vmul.f32 %v1195_v45, %v903_v48  ;;  %v713_v4 = vmul.f32 %v1620_v0, %v1584_v62 }
 0x5ee   :  { %v825_v31 = vsub.f32 1.5, %v824_v29 }
 0x5ef   :  { %v974_v14 = vmul.f32 %v1191_v41, %v973_v9  ;;  %762 = vrot.lane.b32.xlu2 %v754_v5, %s1257_s6  ;;  %v1627_v15 = vmul.f32 %v993_v7, %v895_v30  ;;  %v905_v34 = vadd.f32 %v1195_v45, %v904_v27  ;;  %v717_v9 = vsel %vm406_vm6, %v713_v4, 0.0 }
 0x5f0   :  { %v826_v32 = vmul.f32 %v1193_v11, %v825_v31 }
 0x5f1   :  { %v975_v18 = vmul.f32 %v974_v14, %v956_v52  ;;  %v909_v54 = vsel %vm908_vm12, %v1195_v45, %v905_v34  ;;  %v1008_v19 = vand.u32 2147483648, %v1627_v15  ;;  %vm1002_vm3 = vweird.f32 %v1627_v15 }
 0x5f2   :  { %v827_v36 = vmul.f32 %v826_v32, %v1597_v10  ;;  %v707_v13 = vpop.f32.mrf.mxu3 }
 0x5f3   :  { %v977_v20 = vsel %vm976_vm4, %v956_v52, %v975_v18 }
 0x5f4   :  { %v980_v21 = vsel %vm978_vm5, %v979_v8, %v977_v20  ;;  %v829_v38 = vsel %vm828_vm7, %v1597_v10, %v827_v36  ;;  %v910_v10 = vand.u32 2147483647, %v1609_v53  ;;  %v1006_v8 = vand.u32 2147483647, %v1627_v15 }
 0x5f5   :  { %v994_v23 = vmax.f32 %v980_v21, 1e-08  ;;  %v832_v40 = vsel %vm830_vm8, %v831_v16, %v829_v38 }
 0x5f6   :  { %v898_v43 = vmax.f32 %v832_v40, 1e-08  ;;  %vm911_vm15 = vcmp.eq.f32.partialorder %v910_v10, 8.507059e+37  ;;  %vm1007_vm9 = vcmp.eq.f32.partialorder %v1006_v8, 8.507059e+37 }
 0x5f7   :  { %v1632_v25 = vmul.f32 %v994_v23, %v896_v22  ;;  %v914_v35 = vsel %vm911_vm15, %v913_v57, %v909_v54 }
 0x5f8   :  { %v900_v44 = vmul.f32 %v898_v43, %v896_v22  ;;  %v1009_v22 = vor.u32 1.1754944e-38, %v1008_v19 }
 0x5f9   :  { %v1023_v62 = vand.u32 2147483648, %v1632_v25  ;;  %vm1017_vm7 = vweird.f32 %v1632_v25  ;;  %v1021_v21 = vand.u32 2147483647, %v1632_v25 }
 0x5fa   :  { %1196 = vrcp.f32 %v900_v44  ;;  %v927_v52 = vand.u32 2147483648, %v900_v44  ;;  %vm921_vm13 = vweird.f32 %v900_v44  ;;  %v925_v56 = vand.u32 2147483647, %v900_v44  ;;  %v710_v43 = vpop.f32.mrf.mxu3 }
 0x5fb   :  { %1198 = vrcp.f32 %v1627_v15  ;;  %v1024_v29 = vor.u32 1.1754944e-38, %v1023_v62  ;;  %vm1022_vm10 = vcmp.eq.f32.partialorder %v1021_v21, 8.507059e+37  ;;  %v716_v45 = vmul.f32 %v710_v43, %v1611_v55 }
 0x5fc   :  { %v928_v37 = vor.u32 1.1754944e-38, %v927_v52  ;;  %1200 = vrcp.f32 %v1632_v25  ;;  %vm926_vm0 = vcmp.eq.f32.partialorder %v925_v56, 8.507059e+37  ;;  %v715_v55 = vmul.f32 %v707_v13, %v1615_v33 }
 0x5fd   :  { %v726_v24 = vsel %vm406_vm6, %v716_v45, 0.0 }
 0x5fe   :  { %v723_v50 = vsel %vm406_vm6, %v715_v55, 0.0 }
 0x600   :  { %v1197_v46 = vpop.eup %1196 }
 0x601   :  { %v917_v47 = vmul.f32 %v1197_v46, %v900_v44  ;;  %vm922_vm11 = vweird.f32 %v1197_v46  ;;  %v1199_v60 = vpop.eup %1198  ;;  %v714_v44 = vmul.f32 %v704_v17, %v1634_v28 }
 0x602   :  { %744 = vrot.lane.b32.xlu1 %v1634_v28, %s1260_s20  ;;  %vm923_vm14 = vmor %vm921_vm13, %vm922_vm11  ;;  %v1201_v1 = vpop.eup %1200  ;;  %v998_v3 = vmul.f32 %v1199_v60, %v1627_v15  ;;  %vm1003_vm2 = vweird.f32 %v1199_v60 }
 0x603   :  { %v918_v49 = vsub.f32 1.0, %v917_v47  ;;  %v1013_v5 = vmul.f32 %v1201_v1, %v1632_v25  ;;  %vm1018_vm4 = vweird.f32 %v1201_v1  ;;  %vm1004_vm5 = vmor %vm1002_vm3, %vm1003_vm2 }
 0x604   :  { %v999_v6 = vsub.f32 1.0, %v998_v3  ;;  %vm1019_vm8 = vmor %vm1017_vm7, %vm1018_vm4 }
 0x605   :  { %v919_v30 = vmul.f32 %v1197_v46, %v918_v49  ;;  %v1014_v7 = vsub.f32 1.0, %v1013_v5 }
 0x606   :  { %v1000_v12 = vmul.f32 %v1199_v60, %v999_v6 }
 0x607   :  { %v920_v51 = vadd.f32 %v1197_v46, %v919_v30  ;;  %v1015_v14 = vmul.f32 %v1201_v1, %v1014_v7 }
 0x608   :  { %v1001_v18 = vadd.f32 %v1199_v60, %v1000_v12 }
 0x609   :  { %v924_v41 = vsel %vm923_vm14, %v1197_v46, %v920_v51  ;;  %v1016_v20 = vadd.f32 %v1201_v1, %v1015_v14  ;;  %v720_v46 = vsel %vm406_vm6, %v714_v44, 0.0 }
 0x60a   :  { %v929_v53 = vsel %vm926_vm0, %v928_v37, %v924_v41  ;;  %v1005_v0 = vsel %vm1004_vm5, %v1199_v60, %v1001_v18 }
 0x60b   :  { %v1020_v11 = vsel %vm1019_vm8, %v1201_v1, %v1016_v20  ;;  %v1010_v26 = vsel %vm1007_vm9, %v1009_v22, %v1005_v0  ;;  %v667_v1 = vld [vmem:[%s1708_s11] sm:$0x3] }
 0x60c   :  { %v1025_v15 = vsel %vm1022_vm10, %v1024_v29, %v1020_v11  ;;  %v729_v4 = vperm.slane %v667_v1, 0  ;;  %v786_v6 = vperm.slane %v667_v1, 1 }
 0x63a   :  { %v891_v42 = vpop.xlane.xlu1 %890 }
 0x63b   :  { %v915_v39 = vmul.f32 %v914_v35, %v891_v42 }
 0x63d   :  { %v932_v61 = vsel %vm931_vm1, %v915_v39, 0.0 }
 0x642   :  { %v894_v58 = vpop.xlane.xlu0 %893  ;;  %v989_v23 = vpop.xlane.xlu2 %988 }
 0x643   :  { %v930_v59 = vmul.f32 %v929_v53, %v894_v58  ;;  %v1011_v31 = vmul.f32 %v1010_v26, %v989_v23 }
 0x645   :  { %v933_v63 = vsel %vm931_vm1, %v930_v59, 0.0  ;;  %v1027_v16 = vsel %vm931_vm1, %v1011_v31, 0.0 }
 0x646   :  { %v934_v2 = vadd.f32 %v933_v63, %v932_v61 }
 0x648   :  { %935 = vadd.xlane.f32.xlu0 %v934_v2 }
 0x64a   :  { %v747_v25 = vpop.permute.xlu2 %746 }
 0x64b   :  { %v756_v30 = vmul.f32 %v747_v25, %v707_v13 }
 0x650   :  { %718 = vadd.xlane.f32.xlu0 %v717_v9 }
 0x652   :  { %v763_v47 = vpop.permute.xlu2 %762 }
 0x653   :  { %v774_v48 = vsel %vm406_vm6, %v763_v47, 0.0 }
 0x655   :  { %v749_v28 = vpop.permute.xlu0 %748 }
 0x656   :  { %v757_v34 = vmul.f32 %v749_v28, %v710_v43 }
 0x658   :  { %727 = vadd.xlane.f32.xlu0 %v726_v24 }
 0x65c   :  { %v992_v32 = vpop.xlane.xlu1 %991 }
 0x65d   :  { %v1026_v36 = vmul.f32 %v1025_v15, %v992_v32 }
 0x65f   :  { %v1028_v38 = vsel %vm931_vm1, %v1026_v36, 0.0 }
 0x660   :  { %v1029_v40 = vadd.f32 %v1028_v38, %v1027_v16 }
 0x662   :  { %1030 = vadd.xlane.f32.xlu1 %v1029_v40 }
 0x66a   :  { %721 = vadd.xlane.f32.xlu1 %v720_v46 }
 0x672   :  { %775 = vadd.xlane.f32.xlu1 %v774_v48 }
 0x674   :  { %v745_v49 = vpop.permute.xlu1 %744 }
 0x675   :  { %v755_v27 = vmul.f32 %v745_v49, %v704_v17 }
 0x677   :  { %764 = vrot.lane.b32.xlu2 %v755_v27, %s1257_s6 }
 0x67f   :  { %766 = vrot.lane.b32.xlu2 %v756_v30, %s1257_s6 }
 0x687   :  { %768 = vrot.lane.b32.xlu2 %v757_v34, %s1257_s6 }
 0x6b0   :  { %724 = vadd.xlane.f32.xlu2 %v723_v50 }
 0x6bb   :  { %v936_v10 = vpop.xlane.xlu0 %935 }
 0x6bc   :  { %v937_v51 = vrot.slane %v936_v10, 4 }
 0x6be   :  { %v938_v52 = vadd.f32 %v937_v51, %v936_v10 }
 0x6c0   :  { %v939_v54 = vrot.slane %v938_v52, 2 }
 0x6c2   :  { %v940_v56 = vadd.f32 %v939_v54, %v938_v52 }
 0x6c3   :  { %v719_v7 = vpop.xlane.xlu0 %718 }
 0x6c4   :  { %v941_v57 = vrot.slane %v940_v56, 1  ;;  %v730_v12 = vmul.f32 %v729_v4, %v719_v7 }
 0x6c6   :  { %v942_v42 = vadd.f32 %v941_v57, %v940_v56 }
 0x6c8   :  { %1156 = vpush %v942_v42 }
 0x6cb   :  { %v728_v18 = vpop.xlane.xlu0 %727 }
 0x6cc   :  { %v733_v26 = vmul.f32 %v729_v4, %v728_v18 }
 0x6d1   :  { %v765_v41 = vpop.permute.xlu2 %764 }
 0x6d2   :  { %v777_v35 = vsel %vm406_vm6, %v765_v41, 0.0 }
 0x6d3   :  { %778 = vadd.xlane.f32.xlu0 %v777_v35 }
 0x6d5   :  { %v1031_v37 = vpop.xlane.xlu1 %1030 }
 0x6d6   :  { %v1032_v39 = vrot.slane %v1031_v37, 4 }
 0x6d8   :  { %v1033_v53 = vadd.f32 %v1032_v39, %v1031_v37 }
 0x6d9   :  { %v767_v58 = vpop.permute.xlu2 %766 }
 0x6da   :  { %v1034_v33 = vrot.slane %v1033_v53, 2  ;;  %v780_v59 = vsel %vm406_vm6, %v767_v58, 0.0 }
 0x6db   :  { %781 = vadd.xlane.f32.xlu1 %v780_v59 }
 0x6dc   :  { %v1035_v60 = vadd.f32 %v1034_v33, %v1033_v53 }
 0x6dd   :  { %v722_v61 = vpop.xlane.xlu1 %721 }
 0x6de   :  { %v1036_v63 = vrot.slane %v1035_v60, 1  ;;  %v731_v8 = vmul.f32 %v729_v4, %v722_v61 }
 0x6e0   :  { %v1037_v2 = vadd.f32 %v1036_v63, %v1035_v60 }
 0x6e1   :  { %v769_v3 = vpop.permute.xlu2 %768 }
 0x6e2   :  { %1158 = vpush %v1037_v2  ;;  %v783_v5 = vsel %vm406_vm6, %v769_v3, 0.0 }
 0x6e3   :  { %784 = vadd.xlane.f32.xlu0 %v783_v5 }
 0x6e5   :  { %v776_v9 = vpop.xlane.xlu1 %775 }
 0x6e6   :  { %v787_v14 = vmul.f32 %v786_v6, %v776_v9 }
 0x6e8   :  { %v791_v17 = vadd.f32 %v787_v14, %v730_v12 }
 0x6ea   :  { %795 = vst [vmem:[%s1712_s15] sm:$0xff] %v791_v17 }
 0x6f9   :  { %s1157_s24 = spop %1156 }
 0x6fa   :  { %s944_s26 = ssub.f32 0.0, %s1157_s24 }
 0x713   :  { %s1159_s27 = spop %1158 }
 0x714   :  { %s1039_s1 = ssub.f32 %s944_s26, %s1159_s27 }
 0x716   :  { %1041 = sst [smem:[#allocation9]] %s1039_s1 }
 0x717   :  { %1054 = dma.smem_to_hbm %s1261_s28, 16, %s1052_s7, [#allocation5]  }
 0x723   :  { %v725_v0 = vpop.xlane.xlu2 %724 }
 0x724   :  { %v732_v22 = vmul.f32 %v729_v4, %v725_v0 }
 0x746   :  { %v779_v19 = vpop.xlane.xlu0 %778 }
 0x747   :  { %v788_v20 = vmul.f32 %v786_v6, %v779_v19 }
 0x749   :  { %v792_v62 = vadd.f32 %v788_v20, %v731_v8 }
 0x74b   :  { %796 = vst [vmem:[%s1712_s15 + $0x8] sm:$0xff] %v792_v62 }
 0x74e   :  { %v782_v21 = vpop.xlane.xlu1 %781 }
 0x74f   :  { %v789_v23 = vmul.f32 %v786_v6, %v782_v21 }
 0x751   :  { %v793_v11 = vadd.f32 %v789_v23, %v732_v22 }
 0x753   :  { %797 = vst [vmem:[%s1712_s15 + $0x10] sm:$0xff] %v793_v11 }
 0x756   :  { %v785_v13 = vpop.xlane.xlu0 %784 }
 0x757   :  { %v790_v29 = vmul.f32 %v786_v6, %v785_v13 }
 0x759   :  { %v794_v31 = vadd.f32 %v790_v29, %v733_v26 }
 0x75b   :  { %798 = vst [vmem:[%s1712_s15 + $0x18] sm:$0xff] %v794_v31 }
 0x75c   :  { %1246 = dma.done.wait [#allocation5], 16  }
 0x75d   :  { %1247 = vsyncadd [#allocation5], 4294967280 }
 0x75e   :  { %1063 = sfence }
 0x75f   :  { %1064 = vsyncpa [#allocation5], 1 }
 0x760   :  { %1065 = vsyncpa [#allocation6], 1 }
 0x761   :  { %1066 = vsyncpa [#allocation8], 1 }

</bundles_post_ra>
